<compile_context>
chip_gen: v7x
topology: tpu7x:2x2x1
jax: 0.10.0
libtpu: 0.0.40
codegen_flags: <defaults>
</compile_context>

<pallas_src>
import functools
import jax
import jax.numpy as jnp
from jax import lax
from jax.experimental import pallas as pl
from jax.experimental.pallas import tpu as pltpu

HIDDEN = 196
NOUT = 10
HPAD = 256      # 196 -> 256 : lane-dense + MXU-aligned
OPAD = 128      # 10  -> 128 : lane-dense output stores
_NEG = -1e30    # mask value for padded logits in log_softmax


def _round_up(x, m):
    return ((x + m - 1) // m) * m


def _masked_log_softmax(o):
    """log_softmax over the first NOUT columns of a lane-padded [B, OPAD] block."""
    col = lax.broadcasted_iota(jnp.int32, o.shape, 1)
    masked = jnp.where(col < NOUT, o, _NEG)
    m = jnp.max(masked, axis=1, keepdims=True)
    s = masked - m
    return s - jnp.log(jnp.sum(jnp.exp(s), axis=1, keepdims=True))


# ------------------------- 'forward' mode kernel -------------------------
def _pcmlp_forward_kernel(i_ref,
                          win_ref, bin_ref, wab_ref, bab_ref, wout_ref, bout_ref,
                          out_ref, anew_ref, bnew_ref, onew_ref):
    i = i_ref[...]
    a_new = jnp.maximum(
        jnp.dot(i, win_ref[...], preferred_element_type=jnp.float32) + bin_ref[...], 0.0)
    b_new = jnp.maximum(
        jnp.dot(a_new, wab_ref[...], preferred_element_type=jnp.float32) + bab_ref[...], 0.0)
    o_new = jnp.dot(b_new, wout_ref[...], preferred_element_type=jnp.float32) + bout_ref[...]
    anew_ref[...] = a_new
    bnew_ref[...] = b_new
    onew_ref[...] = o_new
    out_ref[...] = _masked_log_softmax(o_new)


# --------------------------- 'full' mode kernel ---------------------------
def _pcmlp_full_kernel(scal_ref,                 # SMEM: [gammaFw, betaBw, 2/(B*H), alphaRec*B]
                       i_ref, a_ref, b_ref,
                       win_ref, bin_ref, wab_ref, bab_ref,
                       wba_t_ref, bba_ref, wba_raw_ref, wout_ref, bout_ref,
                       out_ref, anew_ref, bnew_ref, onew_ref, recon_ref):
    gamma_fw = scal_ref[0]
    beta_bw = scal_ref[1]
    recon_coef = scal_ref[2]
    rec_scale = scal_ref[3]

    i = i_ref[...]
    a = a_ref[...]
    b = b_ref[...]

    # fcin(i), fcBA(b)
    fcin_i = jnp.dot(i, win_ref[...], preferred_element_type=jnp.float32) + bin_ref[...]
    fcba_b = jnp.dot(b, wba_t_ref[...], preferred_element_type=jnp.float32) + bba_ref[...]

    # reconstructionA = d/db mse(fcBA(b), a) = (2/(B*H)) * (fcBA(b) - a) @ W_BA
    # wba_raw_ref holds W_BA in its original [out, in] layout -> plain contraction,
    # no in-kernel transpose needed.
    diff = fcba_b - a
    recon = recon_coef * jnp.dot(diff, wba_raw_ref[...], preferred_element_type=jnp.float32)
    recon_ref[...] = recon

    a_new = (gamma_fw * jnp.maximum(fcin_i, 0.0)
             + (1.0 - gamma_fw - beta_bw) * a
             + beta_bw * jnp.maximum(fcba_b, 0.0))
    anew_ref[...] = a_new

    fcab_a = jnp.dot(a_new, wab_ref[...], preferred_element_type=jnp.float32) + bab_ref[...]
    b_new = gamma_fw * jnp.maximum(fcab_a, 0.0) + (1.0 - gamma_fw) * b - rec_scale * recon
    bnew_ref[...] = b_new

    o_new = jnp.dot(b_new, wout_ref[...], preferred_element_type=jnp.float32) + bout_ref[...]
    onew_ref[...] = o_new
    out_ref[...] = _masked_log_softmax(o_new)


# ------------------------------- wrapper ---------------------------------
def init_pcmlp_params(key, memory, alphaRec, betaFB, gammaFw):
    """Deterministic init mimicking torch.nn.Linear default (uniform +-1/sqrt(fan_in))."""
    ks = jax.random.split(key, 8)

    def linear(kw, kb, fan_in, fan_out):
        lim = 1.0 / jnp.sqrt(jnp.float32(fan_in))
        w = jax.random.uniform(kw, (fan_out, fan_in), jnp.float32, -lim, lim)  # torch [out, in]
        bias = jax.random.uniform(kb, (fan_out,), jnp.float32, -lim, lim)
        return w, bias

    w_in, b_in = linear(ks[0], ks[1], HIDDEN, HIDDEN)
    w_ab, b_ab = linear(ks[2], ks[3], HIDDEN, HIDDEN)
    w_ba, b_ba = linear(ks[4], ks[5], HIDDEN, HIDDEN)
    w_out, b_out = linear(ks[6], ks[7], HIDDEN, NOUT)
    return dict(
        w_in=w_in, b_in=b_in, w_ab=w_ab, b_ab=b_ab,
        w_ba=w_ba, b_ba=b_ba, w_out=w_out, b_out=b_out,
        memory=float(memory), alphaRec=float(alphaRec),
        betaFB=float(betaFB), gammaFw=float(gammaFw),
    )


@functools.partial(jax.jit, static_argnames=("networkMode",))
def pcmlp_forward(params, i, a, b, o, networkMode):
    assert networkMode in ("forward", "full")
    f32 = jnp.float32
    batch = i.shape[0]

    # Batch tiling: TB rows per grid step (multiple of 8 sublanes, capped at 512).
    TB = min(512, _round_up(batch, 8))
    batch_pad = _round_up(batch, TB)
    grid = (batch_pad // TB,)

    def pad2(x, rows, cols):
        r, c = x.shape
        return jnp.pad(x.astype(f32), ((0, rows - r), (0, cols - c)))

    # Weights (torch layout [out, in]) -> padded, pre-transposed [in, out];
    # plus the raw (un-transposed) W_BA for the recon matmul.
    w_in_t = pad2(params["w_in"].T, HPAD, HPAD)
    w_ab_t = pad2(params["w_ab"].T, HPAD, HPAD)
    w_ba_t = pad2(params["w_ba"].T, HPAD, HPAD)
    w_ba_raw = pad2(params["w_ba"], HPAD, HPAD)
    w_out_t = pad2(params["w_out"].T, HPAD, OPAD)
    b_in = pad2(params["b_in"].reshape(1, -1), 1, HPAD)
    b_ab = pad2(params["b_ab"].reshape(1, -1), 1, HPAD)
    b_ba = pad2(params["b_ba"].reshape(1, -1), 1, HPAD)
    b_out = pad2(params["b_out"].reshape(1, -1), 1, OPAD)

    i_p = pad2(i, batch_pad, HPAD)

    # Block specs: activations tiled over batch, weights/biases resident (constant index_map).
    act_tile = pl.BlockSpec((TB, HPAD), lambda t: (t, 0))
    o_tile = pl.BlockSpec((TB, OPAD), lambda t: (t, 0))
    w_hh = pl.BlockSpec((HPAD, HPAD), lambda t: (0, 0))
    w_ho = pl.BlockSpec((HPAD, OPAD), lambda t: (0, 0))
    b_h = pl.BlockSpec((1, HPAD), lambda t: (0, 0))
    b_o = pl.BlockSpec((1, OPAD), lambda t: (0, 0))
    smem = pl.BlockSpec(memory_space=pltpu.MemorySpace.SMEM)

    cparams = pltpu.CompilerParams(
        dimension_semantics=("parallel",),          # megacore sharding on v7x
        vmem_limit_bytes=32 * 1024 * 1024,
    )

    if networkMode == "forward":
        out_p, a_new_p, b_new_p, o_new_p = pl.pallas_call(
            _pcmlp_forward_kernel,
            out_shape=(
                jax.ShapeDtypeStruct((batch_pad, OPAD), f32),
                jax.ShapeDtypeStruct((batch_pad, HPAD), f32),
                jax.ShapeDtypeStruct((batch_pad, HPAD), f32),
                jax.ShapeDtypeStruct((batch_pad, OPAD), f32),
            ),
            grid_spec=pltpu.PrefetchScalarGridSpec(
                num_scalar_prefetch=0,
                grid=grid,
                in_specs=[act_tile, w_hh, b_h, w_hh, b_h, w_ho, b_o],
                out_specs=(o_tile, act_tile, act_tile, o_tile),
            ),
            compiler_params=cparams,
        )(i_p, w_in_t, b_in, w_ab_t, b_ab, w_out_t, b_out)
        out = out_p[:batch, :NOUT]
        a_new = a_new_p[:batch, :HIDDEN]
        b_new = b_new_p[:batch, :HIDDEN]
        o_new = o_new_p[:batch, :NOUT]
        return out, i, a_new, b_new, o_new, []      # empty recon, matching PyTorch

    # 'full' mode — blend coefficients computed branchlessly (jit-safe; the original
    # `if params["betaFB"] == 0:` branched on a tracer and crashed).
    sg = jax.nn.sigmoid
    gammaFw_p = jnp.asarray(params["gammaFw"], f32)
    betaFB_p = jnp.asarray(params["betaFB"], f32)
    memory_p = jnp.asarray(params["memory"], f32)
    alphaRec_p = jnp.asarray(params["alphaRec"], f32)
    sg_g, sg_b, sg_m = sg(gammaFw_p), sg(betaFB_p), sg(memory_p)
    is_zero = betaFB_p == 0
    den = jnp.where(is_zero, sg_g + sg_m, sg_g + sg_b + sg_m)
    gamma_eff = sg_g / den
    beta_eff = jnp.where(is_zero, jnp.float32(0.0), sg_b / den)

    scal = jnp.stack([
        gamma_eff,
        beta_eff,
        jnp.float32(2.0 / (batch * HIDDEN)),   # mse-grad coefficient
        alphaRec_p * jnp.float32(batch),       # alphaRec * batchSize
    ]).astype(f32)

    a_p = pad2(a, batch_pad, HPAD)
    b_p = pad2(b, batch_pad, HPAD)

    out_p, a_new_p, b_new_p, o_new_p, recon_p = pl.pallas_call(
        _pcmlp_full_kernel,
        out_shape=(
            jax.ShapeDtypeStruct((batch_pad, OPAD), f32),
            jax.ShapeDtypeStruct((batch_pad, HPAD), f32),
            jax.ShapeDtypeStruct((batch_pad, HPAD), f32),
            jax.ShapeDtypeStruct((batch_pad, OPAD), f32),
            jax.ShapeDtypeStruct((batch_pad, HPAD), f32),
        ),
        grid_spec=pltpu.PrefetchScalarGridSpec(
            num_scalar_prefetch=0,
            grid=grid,
            in_specs=[smem, act_tile, act_tile, act_tile,
                      w_hh, b_h, w_hh, b_h, w_hh, b_h, w_hh, w_ho, b_o],
            out_specs=(o_tile, act_tile, act_tile, o_tile, act_tile),
        ),
        compiler_params=cparams,
    )(scal, i_p, a_p, b_p,
      w_in_t, b_in, w_ab_t, b_ab, w_ba_t, b_ba, w_ba_raw, w_out_t, b_out)

    out = out_p[:batch, :NOUT]
    a_new = a_new_p[:batch, :HIDDEN]
    b_new = b_new_p[:batch, :HIDDEN]
    o_new = o_new_p[:batch, :NOUT]
    recon = recon_p[:batch, :HIDDEN]
    return out, i, a_new, b_new, o_new, recon


# ---------------------------- pure-JAX references ---------------------------
def _reference_full(params, i, a, b):
    relu = lambda x: jnp.maximum(x, 0.0)
    lin = lambda x, w, bb: x @ w.T + bb
    sg = jax.nn.sigmoid
    batch = a.shape[0]
    if params["betaFB"] == 0:
        den = sg(params["gammaFw"]) + sg(params["memory"])
        g, bw = sg(params["gammaFw"]) / den, 0.0
    else:
        den = sg(params["gammaFw"]) + sg(params["betaFB"]) + sg(params["memory"])
        g, bw = sg(params["gammaFw"]) / den, sg(params["betaFB"]) / den
    fcba_b = lin(b, params["w_ba"], params["b_ba"])
    recon = (2.0 / (batch * HIDDEN)) * (fcba_b - a) @ params["w_ba"]
    a_new = g * relu(lin(i, params["w_in"], params["b_in"])) + (1 - g - bw) * a + bw * relu(fcba_b)
    b_new = (g * relu(lin(a_new, params["w_ab"], params["b_ab"])) + (1 - g) * b
             - params["alphaRec"] * batch * recon)
    o_new = lin(b_new, params["w_out"], params["b_out"])
    return jax.nn.log_softmax(o_new, axis=1), a_new, b_new, o_new, recon


def _reference_forward(params, i):
    relu = lambda x: jnp.maximum(x, 0.0)
    lin = lambda x, w, bb: x @ w.T + bb
    a_new = relu(lin(i, params["w_in"], params["b_in"]))
    b_new = relu(lin(a_new, params["w_ab"], params["b_ab"]))
    o_new = lin(b_new, params["w_out"], params["b_out"])
    return jax.nn.log_softmax(o_new, axis=1), a_new, b_new, o_new


if __name__ == "__main__":
    key = jax.random.PRNGKey(0)
    kp, ki, ka, kb = jax.random.split(key, 4)

    batch = 8
    params = init_pcmlp_params(kp, memory=0.5, alphaRec=0.1, betaFB=0.3, gammaFw=0.8)

    i = jax.random.normal(ki, (batch, HIDDEN), jnp.float32)
    a = jax.random.normal(ka, (batch, HIDDEN), jnp.float32)
    b = jax.random.normal(kb, (batch, HIDDEN), jnp.float32)
    o = jnp.zeros((batch, NOUT), jnp.float32)   # unused by forward(), kept for API parity

    # 'full' mode (the interesting predictive-coding path)
    out, i_ret, a_new, b_new, o_new, recon = pcmlp_forward(params, i, a, b, o, "full")
    jax.block_until_ready((out, a_new, b_new, o_new, recon))

    # 'forward' mode
    out_f, _, a_f, b_f, o_f, _ = pcmlp_forward(params, i, a, b, o, "forward")
    jax.block_until_ready((out_f, a_f, b_f, o_f))

    # correctness checks vs pure-JAX references
    r_out, r_a, r_b, r_o, r_rec = _reference_full(params, i, a, b)
    for got, ref in ((out, r_out), (a_new, r_a), (b_new, r_b), (o_new, r_o), (recon, r_rec)):
        assert jnp.allclose(got, ref, atol=1e-4, rtol=1e-4), "full-mode mismatch vs reference"

    rf_out, rf_a, rf_b, rf_o = _reference_forward(params, i)
    for got, ref in ((out_f, rf_out), (a_f, rf_a), (b_f, rf_b), (o_f, rf_o)):
        assert jnp.allclose(got, ref, atol=1e-4, rtol=1e-4), "forward-mode mismatch vs reference"

    print("KERNEL_OK")
</pallas_src>

<mosaic_0001>
module attributes {stable_mosaic.version = 11 : i64} {
  func.func @_pcmlp_full_kernel(%arg0: i32, %arg1: memref<4xf32, #tpu.memory_space<smem>>, %arg2: memref<8x256xf32, #tpu.memory_space<vmem>>, %arg3: memref<8x256xf32, #tpu.memory_space<vmem>>, %arg4: memref<8x256xf32, #tpu.memory_space<vmem>>, %arg5: memref<256x256xf32, #tpu.memory_space<vmem>>, %arg6: memref<1x256xf32, #tpu.memory_space<vmem>>, %arg7: memref<256x256xf32, #tpu.memory_space<vmem>>, %arg8: memref<1x256xf32, #tpu.memory_space<vmem>>, %arg9: memref<256x256xf32, #tpu.memory_space<vmem>>, %arg10: memref<1x256xf32, #tpu.memory_space<vmem>>, %arg11: memref<256x256xf32, #tpu.memory_space<vmem>>, %arg12: memref<256x128xf32, #tpu.memory_space<vmem>>, %arg13: memref<1x128xf32, #tpu.memory_space<vmem>>, %arg14: memref<8x128xf32, #tpu.memory_space<vmem>>, %arg15: memref<8x256xf32, #tpu.memory_space<vmem>>, %arg16: memref<8x256xf32, #tpu.memory_space<vmem>>, %arg17: memref<8x128xf32, #tpu.memory_space<vmem>>, %arg18: memref<8x256xf32, #tpu.memory_space<vmem>>) attributes {dimension_semantics = [#tpu.dimension_semantics<parallel>], iteration_bounds = array<i64: 1>, scalar_prefetch = 0 : i64, scratch_operands = 0 : i64, tpu.core_type = #tpu.core_type<tc>, window_params = [{transform_indices = @transform_0, window_bounds = array<i64: 4>}, {transform_indices = @transform_1, window_bounds = array<i64: 8, 256>}, {transform_indices = @transform_2, window_bounds = array<i64: 8, 256>}, {transform_indices = @transform_3, window_bounds = array<i64: 8, 256>}, {pipeline_mode = #tpu.pipeline_mode<synchronous>, transform_indices = @transform_4, window_bounds = array<i64: 256, 256>}, {pipeline_mode = #tpu.pipeline_mode<synchronous>, transform_indices = @transform_5, window_bounds = array<i64: 1, 256>}, {pipeline_mode = #tpu.pipeline_mode<synchronous>, transform_indices = @transform_6, window_bounds = array<i64: 256, 256>}, {pipeline_mode = #tpu.pipeline_mode<synchronous>, transform_indices = @transform_7, window_bounds = array<i64: 1, 256>}, {pipeline_mode = #tpu.pipeline_mode<synchronous>, transform_indices = @transform_8, window_bounds = array<i64: 256, 256>}, {pipeline_mode = #tpu.pipeline_mode<synchronous>, transform_indices = @transform_9, window_bounds = array<i64: 1, 256>}, {pipeline_mode = #tpu.pipeline_mode<synchronous>, transform_indices = @transform_10, window_bounds = array<i64: 256, 256>}, {pipeline_mode = #tpu.pipeline_mode<synchronous>, transform_indices = @transform_11, window_bounds = array<i64: 256, 128>}, {pipeline_mode = #tpu.pipeline_mode<synchronous>, transform_indices = @transform_12, window_bounds = array<i64: 1, 128>}, {transform_indices = @transform_13, window_bounds = array<i64: 8, 128>}, {transform_indices = @transform_14, window_bounds = array<i64: 8, 256>}, {transform_indices = @transform_15, window_bounds = array<i64: 8, 256>}, {transform_indices = @transform_16, window_bounds = array<i64: 8, 128>}, {transform_indices = @transform_17, window_bounds = array<i64: 8, 256>}]} {
    %c0 = arith.constant 0 : index
    %0 = memref.load %arg1[%c0] : memref<4xf32, #tpu.memory_space<smem>>
    %c1 = arith.constant 1 : index
    %1 = memref.load %arg1[%c1] : memref<4xf32, #tpu.memory_space<smem>>
    %c2 = arith.constant 2 : index
    %2 = memref.load %arg1[%c2] : memref<4xf32, #tpu.memory_space<smem>>
    %c3 = arith.constant 3 : index
    %3 = memref.load %arg1[%c3] : memref<4xf32, #tpu.memory_space<smem>>
    %c0_0 = arith.constant 0 : index
    %c0_1 = arith.constant 0 : index
    %4 = vector.load %arg2[%c0_0, %c0_1] : memref<8x256xf32, #tpu.memory_space<vmem>>, vector<8x256xf32>
    %c0_2 = arith.constant 0 : index
    %c0_3 = arith.constant 0 : index
    %5 = vector.load %arg3[%c0_2, %c0_3] : memref<8x256xf32, #tpu.memory_space<vmem>>, vector<8x256xf32>
    %c0_4 = arith.constant 0 : index
    %c0_5 = arith.constant 0 : index
    %6 = vector.load %arg4[%c0_4, %c0_5] : memref<8x256xf32, #tpu.memory_space<vmem>>, vector<8x256xf32>
    %c0_6 = arith.constant 0 : index
    %c0_7 = arith.constant 0 : index
    %7 = vector.load %arg5[%c0_6, %c0_7] : memref<256x256xf32, #tpu.memory_space<vmem>>, vector<256x256xf32>
    %cst = arith.constant dense<0.000000e+00> : vector<8x256xf32>
    %8 = tpu.matmul %4, %7, %cst {dimension_numbers = #tpu.dot_dimension_numbers<[1], [0], [0], [1], [0, 0, 1, 1], [], []>} : vector<8x256xf32>, vector<256x256xf32>, vector<8x256xf32> -> vector<8x256xf32>
    %c0_8 = arith.constant 0 : index
    %c0_9 = arith.constant 0 : index
    %9 = vector.load %arg6[%c0_8, %c0_9] : memref<1x256xf32, #tpu.memory_space<vmem>>, vector<1x256xf32>
    %10 = vector.broadcast %9 : vector<1x256xf32> to vector<8x256xf32>
    %11 = arith.addf %8, %10 : vector<8x256xf32>
    %c0_10 = arith.constant 0 : index
    %c0_11 = arith.constant 0 : index
    %12 = vector.load %arg9[%c0_10, %c0_11] : memref<256x256xf32, #tpu.memory_space<vmem>>, vector<256x256xf32>
    %cst_12 = arith.constant dense<0.000000e+00> : vector<8x256xf32>
    %13 = tpu.matmul %6, %12, %cst_12 {dimension_numbers = #tpu.dot_dimension_numbers<[1], [0], [0], [1], [0, 0, 1, 1], [], []>} : vector<8x256xf32>, vector<256x256xf32>, vector<8x256xf32> -> vector<8x256xf32>
    %c0_13 = arith.constant 0 : index
    %c0_14 = arith.constant 0 : index
    %14 = vector.load %arg10[%c0_13, %c0_14] : memref<1x256xf32, #tpu.memory_space<vmem>>, vector<1x256xf32>
    %15 = vector.broadcast %14 : vector<1x256xf32> to vector<8x256xf32>
    %16 = arith.addf %13, %15 : vector<8x256xf32>
    %17 = arith.subf %16, %5 : vector<8x256xf32>
    %c0_15 = arith.constant 0 : index
    %c0_16 = arith.constant 0 : index
    %18 = vector.load %arg11[%c0_15, %c0_16] : memref<256x256xf32, #tpu.memory_space<vmem>>, vector<256x256xf32>
    %cst_17 = arith.constant dense<0.000000e+00> : vector<8x256xf32>
    %19 = tpu.matmul %17, %18, %cst_17 {dimension_numbers = #tpu.dot_dimension_numbers<[1], [0], [0], [1], [0, 0, 1, 1], [], []>} : vector<8x256xf32>, vector<256x256xf32>, vector<8x256xf32> -> vector<8x256xf32>
    %20 = vector.broadcast %2 : f32 to vector<8x256xf32>
    %21 = arith.mulf %20, %19 : vector<8x256xf32>
    %c0_18 = arith.constant 0 : index
    %c0_19 = arith.constant 0 : index
    %22 = vector.load %arg18[%c0_18, %c0_19] : memref<8x256xf32, #tpu.memory_space<vmem>>, vector<8x256xf32>
    tpu.vector_store %arg18[%c0_18, %c0_19], %21 {strides = array<i32>} : memref<8x256xf32, #tpu.memory_space<vmem>>, vector<8x256xf32>,
    %cst_20 = arith.constant 0.000000e+00 : f32
    %23 = vector.broadcast %cst_20 : f32 to vector<8x256xf32>
    %24 = arith.maximumf %11, %23 : vector<8x256xf32>
    %25 = vector.broadcast %0 : f32 to vector<8x256xf32>
    %26 = arith.mulf %25, %24 : vector<8x256xf32>
    %cst_21 = arith.constant 1.000000e+00 : f32
    %27 = arith.subf %cst_21, %0 : f32
    %28 = arith.subf %27, %1 : f32
    %29 = vector.broadcast %28 : f32 to vector<8x256xf32>
    %30 = arith.mulf %29, %5 : vector<8x256xf32>
    %31 = arith.addf %26, %30 : vector<8x256xf32>
    %cst_22 = arith.constant 0.000000e+00 : f32
    %32 = vector.broadcast %cst_22 : f32 to vector<8x256xf32>
    %33 = arith.maximumf %16, %32 : vector<8x256xf32>
    %34 = vector.broadcast %1 : f32 to vector<8x256xf32>
    %35 = arith.mulf %34, %33 : vector<8x256xf32>
    %36 = arith.addf %31, %35 : vector<8x256xf32>
    %c0_23 = arith.constant 0 : index
    %c0_24 = arith.constant 0 : index
    %37 = vector.load %arg15[%c0_23, %c0_24] : memref<8x256xf32, #tpu.memory_space<vmem>>, vector<8x256xf32>
    tpu.vector_store %arg15[%c0_23, %c0_24], %36 {strides = array<i32>} : memref<8x256xf32, #tpu.memory_space<vmem>>, vector<8x256xf32>,
    %c0_25 = arith.constant 0 : index
    %c0_26 = arith.constant 0 : index
    %38 = vector.load %arg7[%c0_25, %c0_26] : memref<256x256xf32, #tpu.memory_space<vmem>>, vector<256x256xf32>
    %cst_27 = arith.constant dense<0.000000e+00> : vector<8x256xf32>
    %39 = tpu.matmul %36, %38, %cst_27 {dimension_numbers = #tpu.dot_dimension_numbers<[1], [0], [0], [1], [0, 0, 1, 1], [], []>} : vector<8x256xf32>, vector<256x256xf32>, vector<8x256xf32> -> vector<8x256xf32>
    %c0_28 = arith.constant 0 : index
    %c0_29 = arith.constant 0 : index
    %40 = vector.load %arg8[%c0_28, %c0_29] : memref<1x256xf32, #tpu.memory_space<vmem>>, vector<1x256xf32>
    %41 = vector.broadcast %40 : vector<1x256xf32> to vector<8x256xf32>
    %42 = arith.addf %39, %41 : vector<8x256xf32>
    %cst_30 = arith.constant 0.000000e+00 : f32
    %43 = vector.broadcast %cst_30 : f32 to vector<8x256xf32>
    %44 = arith.maximumf %42, %43 : vector<8x256xf32>
    %45 = vector.broadcast %0 : f32 to vector<8x256xf32>
    %46 = arith.mulf %45, %44 : vector<8x256xf32>
    %cst_31 = arith.constant 1.000000e+00 : f32
    %47 = arith.subf %cst_31, %0 : f32
    %48 = vector.broadcast %47 : f32 to vector<8x256xf32>
    %49 = arith.mulf %48, %6 : vector<8x256xf32>
    %50 = arith.addf %46, %49 : vector<8x256xf32>
    %51 = vector.broadcast %3 : f32 to vector<8x256xf32>
    %52 = arith.mulf %51, %21 : vector<8x256xf32>
    %53 = arith.subf %50, %52 : vector<8x256xf32>
    %c0_32 = arith.constant 0 : index
    %c0_33 = arith.constant 0 : index
    %54 = vector.load %arg16[%c0_32, %c0_33] : memref<8x256xf32, #tpu.memory_space<vmem>>, vector<8x256xf32>
    tpu.vector_store %arg16[%c0_32, %c0_33], %53 {strides = array<i32>} : memref<8x256xf32, #tpu.memory_space<vmem>>, vector<8x256xf32>,
    %c0_34 = arith.constant 0 : index
    %c0_35 = arith.constant 0 : index
    %55 = vector.load %arg12[%c0_34, %c0_35] : memref<256x128xf32, #tpu.memory_space<vmem>>, vector<256x128xf32>
    %cst_36 = arith.constant dense<0.000000e+00> : vector<8x128xf32>
    %56 = tpu.matmul %53, %55, %cst_36 {dimension_numbers = #tpu.dot_dimension_numbers<[1], [0], [0], [1], [0, 0, 1, 1], [], []>} : vector<8x256xf32>, vector<256x128xf32>, vector<8x128xf32> -> vector<8x128xf32>
    %c0_37 = arith.constant 0 : index
    %c0_38 = arith.constant 0 : index
    %57 = vector.load %arg13[%c0_37, %c0_38] : memref<1x128xf32, #tpu.memory_space<vmem>>, vector<1x128xf32>
    %58 = vector.broadcast %57 : vector<1x128xf32> to vector<8x128xf32>
    %59 = arith.addf %56, %58 : vector<8x128xf32>
    %c0_39 = arith.constant 0 : index
    %c0_40 = arith.constant 0 : index
    %60 = vector.load %arg17[%c0_39, %c0_40] : memref<8x128xf32, #tpu.memory_space<vmem>>, vector<8x128xf32>
    tpu.vector_store %arg17[%c0_39, %c0_40], %59 {strides = array<i32>} : memref<8x128xf32, #tpu.memory_space<vmem>>, vector<8x128xf32>,
    %61 = tpu.iota {dimensions = array<i32: 1>} : vector<8x128xi32>
    %c10_i32 = arith.constant 10 : i32
    %62 = vector.broadcast %c10_i32 : i32 to vector<8x128xi32>
    %63 = arith.cmpi slt, %61, %62 : vector<8x128xi32>
    %cst_41 = arith.constant -1.000000e+30 : f32
    %64 = vector.broadcast %cst_41 : f32 to vector<8x128xf32>
    %65 = arith.select %63, %59, %64 : vector<8x128xi1>, vector<8x128xf32>
    %cst_42 = arith.constant dense<0xFF800000> : vector<8xf32>
    %66 = vector.multi_reduction <maximumf>, %65, %cst_42 [1] : vector<8x128xf32> to vector<8xf32>
    %67 = vector.shape_cast %66 : vector<8xf32> to vector<8x1xf32>
    %68 = vector.broadcast %67 : vector<8x1xf32> to vector<8x128xf32>
    %69 = arith.subf %65, %68 : vector<8x128xf32>
    %70 = math.exp %69 : vector<8x128xf32>
    %cst_43 = arith.constant dense<0.000000e+00> : vector<8xf32>
    %71 = vector.multi_reduction <add>, %70, %cst_43 [1] : vector<8x128xf32> to vector<8xf32>
    %72 = vector.shape_cast %71 : vector<8xf32> to vector<8x1xf32>
    %73 = math.log %72 : vector<8x1xf32>
    %74 = vector.broadcast %73 : vector<8x1xf32> to vector<8x128xf32>
    %75 = arith.subf %69, %74 : vector<8x128xf32>
    %c0_44 = arith.constant 0 : index
    %c0_45 = arith.constant 0 : index
    %76 = vector.load %arg14[%c0_44, %c0_45] : memref<8x128xf32, #tpu.memory_space<vmem>>, vector<8x128xf32>
    tpu.vector_store %arg14[%c0_44, %c0_45], %75 {strides = array<i32>} : memref<8x128xf32, #tpu.memory_space<vmem>>, vector<8x128xf32>,
    return
  }
  func.func @transform_0(%arg0: i32) -> i32 {
    %c0_i32 = arith.constant 0 : i32
    %c0_i32_0 = arith.constant 0 : i32
    return %c0_i32 : i32
  }
  func.func @transform_1(%arg0: i32) -> (i32, i32) {
    %c0_i32 = arith.constant 0 : i32
    %c0_i32_0 = arith.constant 0 : i32
    return %arg0, %c0_i32 : i32, i32
  }
  func.func @transform_2(%arg0: i32) -> (i32, i32) {
    %c0_i32 = arith.constant 0 : i32
    %c0_i32_0 = arith.constant 0 : i32
    return %arg0, %c0_i32 : i32, i32
  }
  func.func @transform_3(%arg0: i32) -> (i32, i32) {
    %c0_i32 = arith.constant 0 : i32
    %c0_i32_0 = arith.constant 0 : i32
    return %arg0, %c0_i32 : i32, i32
  }
  func.func @transform_4(%arg0: i32) -> (i32, i32) {
    %c0_i32 = arith.constant 0 : i32
    %c0_i32_0 = arith.constant 0 : i32
    %c0_i32_1 = arith.constant 0 : i32
    return %c0_i32, %c0_i32_0 : i32, i32
  }
  func.func @transform_5(%arg0: i32) -> (i32, i32) {
    %c0_i32 = arith.constant 0 : i32
    %c0_i32_0 = arith.constant 0 : i32
    %c0_i32_1 = arith.constant 0 : i32
    return %c0_i32, %c0_i32_0 : i32, i32
  }
  func.func @transform_6(%arg0: i32) -> (i32, i32) {
    %c0_i32 = arith.constant 0 : i32
    %c0_i32_0 = arith.constant 0 : i32
    %c0_i32_1 = arith.constant 0 : i32
    return %c0_i32, %c0_i32_0 : i32, i32
  }
  func.func @transform_7(%arg0: i32) -> (i32, i32) {
    %c0_i32 = arith.constant 0 : i32
    %c0_i32_0 = arith.constant 0 : i32
    %c0_i32_1 = arith.constant 0 : i32
    return %c0_i32, %c0_i32_0 : i32, i32
  }
  func.func @transform_8(%arg0: i32) -> (i32, i32) {
    %c0_i32 = arith.constant 0 : i32
    %c0_i32_0 = arith.constant 0 : i32
    %c0_i32_1 = arith.constant 0 : i32
    return %c0_i32, %c0_i32_0 : i32, i32
  }
  func.func @transform_9(%arg0: i32) -> (i32, i32) {
    %c0_i32 = arith.constant 0 : i32
    %c0_i32_0 = arith.constant 0 : i32
    %c0_i32_1 = arith.constant 0 : i32
    return %c0_i32, %c0_i32_0 : i32, i32
  }
  func.func @transform_10(%arg0: i32) -> (i32, i32) {
    %c0_i32 = arith.constant 0 : i32
    %c0_i32_0 = arith.constant 0 : i32
    %c0_i32_1 = arith.constant 0 : i32
    return %c0_i32, %c0_i32_0 : i32, i32
  }
  func.func @transform_11(%arg0: i32) -> (i32, i32) {
    %c0_i32 = arith.constant 0 : i32
    %c0_i32_0 = arith.constant 0 : i32
    %c0_i32_1 = arith.constant 0 : i32
    return %c0_i32, %c0_i32_0 : i32, i32
  }
  func.func @transform_12(%arg0: i32) -> (i32, i32) {
    %c0_i32 = arith.constant 0 : i32
    %c0_i32_0 = arith.constant 0 : i32
    %c0_i32_1 = arith.constant 0 : i32
    return %c0_i32, %c0_i32_0 : i32, i32
  }
  func.func @transform_13(%arg0: i32) -> (i32, i32) {
    %c0_i32 = arith.constant 0 : i32
    %c0_i32_0 = arith.constant 0 : i32
    return %arg0, %c0_i32 : i32, i32
  }
  func.func @transform_14(%arg0: i32) -> (i32, i32) {
    %c0_i32 = arith.constant 0 : i32
    %c0_i32_0 = arith.constant 0 : i32
    return %arg0, %c0_i32 : i32, i32
  }
  func.func @transform_15(%arg0: i32) -> (i32, i32) {
    %c0_i32 = arith.constant 0 : i32
    %c0_i32_0 = arith.constant 0 : i32
    return %arg0, %c0_i32 : i32, i32
  }
  func.func @transform_16(%arg0: i32) -> (i32, i32) {
    %c0_i32 = arith.constant 0 : i32
    %c0_i32_0 = arith.constant 0 : i32
    return %arg0, %c0_i32 : i32, i32
  }
  func.func @transform_17(%arg0: i32) -> (i32, i32) {
    %c0_i32 = arith.constant 0 : i32
    %c0_i32_0 = arith.constant 0 : i32
    return %arg0, %c0_i32 : i32, i32
  }
}

</mosaic_0001>

<bundles_post_ra>
// kernel: pcmlp_forward.1
= control target key start
LH: loop header
LB: loop body
LE: loop exit
PB: predicated region body
PF: predicated region fallthrough
CT: control target
= control target key end

     0   :  { %s2451_s0 = inlined_call_operand.vmem [shape: f32[4], index: 0, kind: input, shape index: {}]   ;;  %s2452_s1 = inlined_call_operand.vmem [shape: f32[8,256], index: 1, kind: input, shape index: {}]   ;;  %s2453_s2 = inlined_call_operand.vmem [shape: f32[8,256], index: 2, kind: input, shape index: {}]   ;;  %s2454_s3 = inlined_call_operand.vmem [shape: f32[8,256], index: 3, kind: input, shape index: {}]   ;;  %s2455_s4 = inlined_call_operand.vmem [shape: f32[256,256], index: 4, kind: input, shape index: {}]   ;;  %s2456_s5 = inlined_call_operand.vmem [shape: f32[1,256], index: 5, kind: input, shape index: {}]   ;;  %s2457_s6 = inlined_call_operand.vmem [shape: f32[256,256], index: 6, kind: input, shape index: {}]   ;;  %s2458_s7 = inlined_call_operand.vmem [shape: f32[1,256], index: 7, kind: input, shape index: {}]   ;;  %s2459_s8 = inlined_call_operand.vmem [shape: f32[256,256], index: 8, kind: input, shape index: {}]   ;;  %s2460_s9 = inlined_call_operand.vmem [shape: f32[1,256], index: 9, kind: input, shape index: {}]   ;;  %s2461_s10 = inlined_call_operand.vmem [shape: f32[256,256], index: 10, kind: input, shape index: {}]   ;;  %s2462_s11 = inlined_call_operand.vmem [shape: f32[256,128], index: 11, kind: input, shape index: {}]   ;;  %s2463_s12 = inlined_call_operand.vmem [shape: f32[1,128], index: 12, kind: input, shape index: {}]   ;;  %s2464_s13 = inlined_call_operand.hbm [shape: f32[8,128], index: 13, kind: output, shape index: {0}]   ;;  %s2465_s14 = inlined_call_operand.hbm [shape: f32[8,256], index: 14, kind: output, shape index: {1}]   ;;  %s2466_s15 = inlined_call_operand.hbm [shape: f32[8,256], index: 15, kind: output, shape index: {2}]   ;;  %s2467_s16 = inlined_call_operand.hbm [shape: f32[8,128], index: 16, kind: output, shape index: {3}]   ;;  %s2468_s17 = inlined_call_operand.hbm [shape: f32[8,256], index: 17, kind: output, shape index: {4}]  }
   0x1   :  { %2470 = sst [smem:[#allocation16_spill]] %s2451_s0 }
   0x2   :  { %2471 = sst [smem:[#allocation17_spill]] %s2452_s1 }
   0x3   :  { %23 = vsyncpa [#allocation4], 0 }
   0x4   :  { %24 = vsyncpa [#allocation3], 0 }
   0x5   :  { %25 = vsyncpa [#allocation7], 0 }
   0x6   :  { %26 = vsyncpa [#allocation10], 0  ;;  %s2472_s26 = sld [smem:[#allocation16_spill]] }
   0xc   :  { %s33_s27 = sshll.u32 %s2472_s26, 4  ;;  %s34_s27 = int_to_ptr.vmem [resolvable:$true] %s33_s27 }
   0xd   :  { %s1226_s28 = scalar_lea.vmem %s34_s27, 16  ;;  %p1231_p1 = scmp.lt.s32.totalorder %s34_s27, %s34_s27 }
   0xe   :  { %p1227_p0 = scmp.ne.s32.totalorder %s34_s27, %s1226_s28  ;;  %p1232_p2 = scmp.lt.s32.totalorder %s1226_s28, %s1226_s28 }
  0x10   :  { %p1233_p3 = por %p1232_p2, %p1231_p1 }
  0x12   :  { %p1234_p4 = pnand %p1233_p3, %p1227_p0 }
  0x14   :  { %1237 = shalt.err (!%p1234_p4)
}
  0x15   :  { %s1356_s29 = smov [#allocation2]  }
  0x16   :  { %36 = dma.vmem_to_smem %s34_s27, 16, %s1356_s29, [#allocation4]  }
  0x17   :  { %1348 = dma.done.wait [#allocation4], 16  }
  0x18   :  { %1349 = vsyncadd [#allocation4], 4294967280 }
  0x19   :  { %64 = sfence }
  0x1a   :  { %v76_v0 = vld [vmem:[%s2455_s4 + $0x8] sm:$0xff]  ;;  %v78_v1 = vld [vmem:[%s2455_s4 + $0x18] sm:$0xff]  ;;  %v75_v5 = vld [vmem:[%s2455_s4] sm:$0xff]  ;;  %s2473_s19 = sld [smem:[#allocation17_spill]]  ;;  %s2247_s22 = sld [smem:[#allocation2]] }
  0x1b   :  { %v223_v2 = vld [vmem:[%s2459_s8 + $0x8] sm:$0xff]  ;;  %v928_v3 = vpack.c.bf16 %v78_v1, %v76_v0  ;;  %v225_v4 = vld [vmem:[%s2459_s8 + $0x18] sm:$0xff]  ;;  %v77_v6 = vld [vmem:[%s2455_s4 + $0x10] sm:$0xff]  ;;  %s2249_s23 = sld [smem:[#allocation2 + $0x1]]  ;;  %s891_s28 = sld [smem:[#allocation2 + $0x3]] }
  0x1c   :  { %v992_v7 = vpack.c.bf16 %v225_v4, %v223_v2  ;;  %v930_v8 = vpack.c.bf16 %v77_v6, %v75_v5  ;;  %v222_v9 = vld [vmem:[%s2459_s8] sm:$0xff]  ;;  %v224_v10 = vld [vmem:[%s2459_s8 + $0x10] sm:$0xff]  ;;  %v80_v11 = vld [vmem:[%s2455_s4 + $0x28] sm:$0xff]  ;;  %s1358_s29 = smov [#allocation9]  }
  0x1d   :  { %929 = vmatprep.subr.bf16.mxu0 %v928_v3  ;;  %v994_v12 = vpack.c.bf16 %v224_v10, %v222_v9  ;;  %v82_v13 = vld [vmem:[%s2455_s4 + $0x38] sm:$0xff]  ;;  %v227_v14 = vld [vmem:[%s2459_s8 + $0x28] sm:$0xff]  ;;  %v79_v18 = vld [vmem:[%s2455_s4 + $0x20] sm:$0xff] }
  0x1e   :  { %v229_v15 = vld [vmem:[%s2459_s8 + $0x38] sm:$0xff]  ;;  %993 = vmatprep.subr.bf16.mxu1 %v992_v7  ;;  %931 = vmatpush1.bf16.msra.mxu0 %v930_v8  ;;  %v932_v16 = vpack.c.bf16 %v82_v13, %v80_v11  ;;  %v81_v19 = vld [vmem:[%s2455_s4 + $0x30] sm:$0xff]  ;;  %v226_v20 = vld [vmem:[%s2459_s8 + $0x20] sm:$0xff] }
  0x1f   :  { %v996_v17 = vpack.c.bf16 %v229_v15, %v227_v14  ;;  %995 = vmatpush1.bf16.msra.mxu1 %v994_v12  ;;  %v934_v21 = vpack.c.bf16 %v81_v19, %v79_v18  ;;  %v228_v22 = vld [vmem:[%s2459_s8 + $0x30] sm:$0xff]  ;;  %v84_v23 = vld [vmem:[%s2455_s4 + $0x48] sm:$0xff]  ;;  %v86_v24 = vld [vmem:[%s2455_s4 + $0x58] sm:$0xff] }
  0x20   :  { %933 = vmatprep.subr.bf16.mxu0 %v932_v16  ;;  %v998_v25 = vpack.c.bf16 %v228_v22, %v226_v20  ;;  %v936_v26 = vpack.c.bf16 %v86_v24, %v84_v23  ;;  %v231_v27 = vld [vmem:[%s2459_s8 + $0x48] sm:$0xff]  ;;  %v233_v28 = vld [vmem:[%s2459_s8 + $0x58] sm:$0xff]  ;;  %v83_v29 = vld [vmem:[%s2455_s4 + $0x40] sm:$0xff] }
  0x21   :  { %997 = vmatprep.subr.bf16.mxu1 %v996_v17  ;;  %v1000_v30 = vpack.c.bf16 %v233_v28, %v231_v27  ;;  %v85_v31 = vld [vmem:[%s2455_s4 + $0x50] sm:$0xff]  ;;  %v230_v32 = vld [vmem:[%s2459_s8 + $0x40] sm:$0xff]  ;;  %v88_v35 = vld [vmem:[%s2455_s4 + $0x68] sm:$0xff] }
  0x22   :  { %v232_v33 = vld [vmem:[%s2459_s8 + $0x50] sm:$0xff]  ;;  %935 = vmatpush1.bf16.msra.mxu0 %v934_v21  ;;  %v938_v34 = vpack.c.bf16 %v85_v31, %v83_v29  ;;  %v90_v36 = vld [vmem:[%s2455_s4 + $0x78] sm:$0xff]  ;;  %v235_v37 = vld [vmem:[%s2459_s8 + $0x68] sm:$0xff] }
  0x23   :  { %999 = vmatpush1.bf16.msra.mxu1 %v998_v25  ;;  %937 = vmatprep.subr.bf16.mxu0 %v936_v26  ;;  %v1002_v38 = vpack.c.bf16 %v232_v33, %v230_v32  ;;  %v940_v39 = vpack.c.bf16 %v90_v36, %v88_v35  ;;  %v237_v40 = vld [vmem:[%s2459_s8 + $0x78] sm:$0xff]  ;;  %v87_v41 = vld [vmem:[%s2455_s4 + $0x60] sm:$0xff]  ;;  %v89_v42 = vld [vmem:[%s2455_s4 + $0x70] sm:$0xff] }
  0x24   :  { %1001 = vmatprep.subr.bf16.mxu1 %v1000_v30  ;;  %v1004_v43 = vpack.c.bf16 %v237_v40, %v235_v37  ;;  %v234_v44 = vld [vmem:[%s2459_s8 + $0x60] sm:$0xff]  ;;  %v236_v45 = vld [vmem:[%s2459_s8 + $0x70] sm:$0xff]  ;;  %v92_v46 = vld [vmem:[%s2455_s4 + $0x88] sm:$0xff]  ;;  %v942_v50 = vpack.c.bf16 %v89_v42, %v87_v41 }
  0x25   :  { %v94_v47 = vld [vmem:[%s2455_s4 + $0x98] sm:$0xff]  ;;  %v239_v48 = vld [vmem:[%s2459_s8 + $0x88] sm:$0xff]  ;;  %v1006_v51 = vpack.c.bf16 %v236_v45, %v234_v44  ;;  %v91_v53 = vld [vmem:[%s2455_s4 + $0x80] sm:$0xff] }
  0x26   :  { %v241_v49 = vld [vmem:[%s2459_s8 + $0x98] sm:$0xff]  ;;  %939 = vmatpush1.bf16.msra.mxu0 %v938_v34  ;;  %v944_v52 = vpack.c.bf16 %v94_v47, %v92_v46  ;;  %v93_v54 = vld [vmem:[%s2455_s4 + $0x90] sm:$0xff]  ;;  %v238_v55 = vld [vmem:[%s2459_s8 + $0x80] sm:$0xff] }
  0x27   :  { %1003 = vmatpush1.bf16.msra.mxu1 %v1002_v38  ;;  %941 = vmatprep.subr.bf16.mxu0 %v940_v39  ;;  %v1008_v56 = vpack.c.bf16 %v241_v49, %v239_v48  ;;  %v240_v57 = vld [vmem:[%s2459_s8 + $0x90] sm:$0xff]  ;;  %v96_v58 = vld [vmem:[%s2455_s4 + $0xa8] sm:$0xff]  ;;  %v98_v59 = vld [vmem:[%s2455_s4 + $0xb8] sm:$0xff]  ;;  %v946_v62 = vpack.c.bf16 %v93_v54, %v91_v53 }
  0x28   :  { %1005 = vmatprep.subr.bf16.mxu1 %v1004_v43  ;;  %v243_v60 = vld [vmem:[%s2459_s8 + $0xa8] sm:$0xff]  ;;  %v245_v61 = vld [vmem:[%s2459_s8 + $0xb8] sm:$0xff]  ;;  %v1010_v63 = vpack.c.bf16 %v240_v57, %v238_v55  ;;  %v948_v0 = vpack.c.bf16 %v98_v59, %v96_v58  ;;  %v95_v1 = vld [vmem:[%s2455_s4 + $0xa0] sm:$0xff] }
  0x29   :  { %v97_v2 = vld [vmem:[%s2455_s4 + $0xb0] sm:$0xff]  ;;  %v242_v3 = vld [vmem:[%s2459_s8 + $0xa0] sm:$0xff]  ;;  %v1012_v4 = vpack.c.bf16 %v245_v61, %v243_v60  ;;  %v100_v6 = vld [vmem:[%s2455_s4 + $0xc8] sm:$0xff] }
  0x2a   :  { %943 = vmatpush1.bf16.msra.mxu0 %v942_v50  ;;  %v244_v5 = vld [vmem:[%s2459_s8 + $0xb0] sm:$0xff]  ;;  %v102_v7 = vld [vmem:[%s2455_s4 + $0xd8] sm:$0xff]  ;;  %v247_v8 = vld [vmem:[%s2459_s8 + $0xc8] sm:$0xff]  ;;  %v950_v10 = vpack.c.bf16 %v97_v2, %v95_v1 }
  0x2b   :  { %1007 = vmatpush1.bf16.msra.mxu1 %v1006_v51  ;;  %945 = vmatprep.subr.bf16.mxu0 %v944_v52  ;;  %v249_v9 = vld [vmem:[%s2459_s8 + $0xd8] sm:$0xff]  ;;  %v1014_v11 = vpack.c.bf16 %v244_v5, %v242_v3  ;;  %v952_v12 = vpack.c.bf16 %v102_v7, %v100_v6  ;;  %v99_v13 = vld [vmem:[%s2455_s4 + $0xc0] sm:$0xff]  ;;  %v101_v14 = vld [vmem:[%s2455_s4 + $0xd0] sm:$0xff] }
  0x2c   :  { %1009 = vmatprep.subr.bf16.mxu1 %v1008_v56  ;;  %v246_v15 = vld [vmem:[%s2459_s8 + $0xc0] sm:$0xff]  ;;  %v1016_v16 = vpack.c.bf16 %v249_v9, %v247_v8  ;;  %v248_v17 = vld [vmem:[%s2459_s8 + $0xd0] sm:$0xff]  ;;  %v104_v18 = vld [vmem:[%s2455_s4 + $0xe8] sm:$0xff]  ;;  %v954_v22 = vpack.c.bf16 %v101_v14, %v99_v13 }
  0x2d   :  { %v106_v19 = vld [vmem:[%s2455_s4 + $0xf8] sm:$0xff]  ;;  %v251_v20 = vld [vmem:[%s2459_s8 + $0xe8] sm:$0xff]  ;;  %v1018_v23 = vpack.c.bf16 %v248_v17, %v246_v15  ;;  %v103_v25 = vld [vmem:[%s2455_s4 + $0xe0] sm:$0xff] }
  0x2e   :  { %947 = vmatpush1.bf16.msra.mxu0 %v946_v62  ;;  %v253_v21 = vld [vmem:[%s2459_s8 + $0xf8] sm:$0xff]  ;;  %v956_v24 = vpack.c.bf16 %v106_v19, %v104_v18  ;;  %v105_v26 = vld [vmem:[%s2455_s4 + $0xf0] sm:$0xff]  ;;  %v250_v27 = vld [vmem:[%s2459_s8 + $0xe0] sm:$0xff] }
  0x2f   :  { %1011 = vmatpush1.bf16.msra.mxu1 %v1010_v63  ;;  %949 = vmatprep.subr.bf16.mxu0 %v948_v0  ;;  %v1020_v28 = vpack.c.bf16 %v253_v21, %v251_v20  ;;  %v252_v29 = vld [vmem:[%s2459_s8 + $0xf0] sm:$0xff]  ;;  %v108_v30 = vld [vmem:[%s2455_s4 + $0x108] sm:$0xff]  ;;  %v110_v31 = vld [vmem:[%s2455_s4 + $0x118] sm:$0xff]  ;;  %v958_v34 = vpack.c.bf16 %v105_v26, %v103_v25 }
  0x30   :  { %1013 = vmatprep.subr.bf16.mxu1 %v1012_v4  ;;  %v255_v32 = vld [vmem:[%s2459_s8 + $0x108] sm:$0xff]  ;;  %v257_v33 = vld [vmem:[%s2459_s8 + $0x118] sm:$0xff]  ;;  %v1022_v35 = vpack.c.bf16 %v252_v29, %v250_v27  ;;  %v960_v36 = vpack.c.bf16 %v110_v31, %v108_v30  ;;  %v107_v37 = vld [vmem:[%s2455_s4 + $0x100] sm:$0xff] }
  0x31   :  { %v109_v38 = vld [vmem:[%s2455_s4 + $0x110] sm:$0xff]  ;;  %v254_v39 = vld [vmem:[%s2459_s8 + $0x100] sm:$0xff]  ;;  %v1024_v40 = vpack.c.bf16 %v257_v33, %v255_v32  ;;  %v112_v42 = vld [vmem:[%s2455_s4 + $0x128] sm:$0xff] }
  0x32   :  { %951 = vmatpush1.bf16.msra.mxu0 %v950_v10  ;;  %v256_v41 = vld [vmem:[%s2459_s8 + $0x110] sm:$0xff]  ;;  %v114_v43 = vld [vmem:[%s2455_s4 + $0x138] sm:$0xff]  ;;  %v259_v44 = vld [vmem:[%s2459_s8 + $0x128] sm:$0xff]  ;;  %v962_v46 = vpack.c.bf16 %v109_v38, %v107_v37 }
  0x33   :  { %1015 = vmatpush1.bf16.msra.mxu1 %v1014_v11  ;;  %953 = vmatprep.subr.bf16.mxu0 %v952_v12  ;;  %v261_v45 = vld [vmem:[%s2459_s8 + $0x138] sm:$0xff]  ;;  %v1026_v47 = vpack.c.bf16 %v256_v41, %v254_v39  ;;  %v964_v48 = vpack.c.bf16 %v114_v43, %v112_v42  ;;  %v111_v49 = vld [vmem:[%s2455_s4 + $0x120] sm:$0xff]  ;;  %v113_v50 = vld [vmem:[%s2455_s4 + $0x130] sm:$0xff] }
  0x34   :  { %1017 = vmatprep.subr.bf16.mxu1 %v1016_v16  ;;  %v258_v51 = vld [vmem:[%s2459_s8 + $0x120] sm:$0xff]  ;;  %v1028_v52 = vpack.c.bf16 %v261_v45, %v259_v44  ;;  %v260_v53 = vld [vmem:[%s2459_s8 + $0x130] sm:$0xff]  ;;  %v116_v54 = vld [vmem:[%s2455_s4 + $0x148] sm:$0xff]  ;;  %v966_v58 = vpack.c.bf16 %v113_v50, %v111_v49 }
  0x35   :  { %v118_v55 = vld [vmem:[%s2455_s4 + $0x158] sm:$0xff]  ;;  %v263_v56 = vld [vmem:[%s2459_s8 + $0x148] sm:$0xff]  ;;  %v1030_v59 = vpack.c.bf16 %v260_v53, %v258_v51  ;;  %v115_v61 = vld [vmem:[%s2455_s4 + $0x140] sm:$0xff] }
  0x36   :  { %955 = vmatpush1.bf16.msra.mxu0 %v954_v22  ;;  %v265_v57 = vld [vmem:[%s2459_s8 + $0x158] sm:$0xff]  ;;  %v968_v60 = vpack.c.bf16 %v118_v55, %v116_v54  ;;  %v117_v62 = vld [vmem:[%s2455_s4 + $0x150] sm:$0xff]  ;;  %v262_v63 = vld [vmem:[%s2459_s8 + $0x140] sm:$0xff] }
  0x37   :  { %1019 = vmatpush1.bf16.msra.mxu1 %v1018_v23  ;;  %957 = vmatprep.subr.bf16.mxu0 %v956_v24  ;;  %v1032_v0 = vpack.c.bf16 %v265_v57, %v263_v56  ;;  %v264_v1 = vld [vmem:[%s2459_s8 + $0x150] sm:$0xff]  ;;  %v120_v2 = vld [vmem:[%s2455_s4 + $0x168] sm:$0xff]  ;;  %v122_v3 = vld [vmem:[%s2455_s4 + $0x178] sm:$0xff]  ;;  %v970_v6 = vpack.c.bf16 %v117_v62, %v115_v61 }
  0x38   :  { %1021 = vmatprep.subr.bf16.mxu1 %v1020_v28  ;;  %v267_v4 = vld [vmem:[%s2459_s8 + $0x168] sm:$0xff]  ;;  %v269_v5 = vld [vmem:[%s2459_s8 + $0x178] sm:$0xff]  ;;  %v119_v7 = vld [vmem:[%s2455_s4 + $0x160] sm:$0xff]  ;;  %v1034_v8 = vpack.c.bf16 %v264_v1, %v262_v63  ;;  %v972_v9 = vpack.c.bf16 %v122_v3, %v120_v2 }
  0x39   :  { %v121_v10 = vld [vmem:[%s2455_s4 + $0x170] sm:$0xff]  ;;  %v266_v11 = vld [vmem:[%s2459_s8 + $0x160] sm:$0xff]  ;;  %v1036_v13 = vpack.c.bf16 %v269_v5, %v267_v4  ;;  %v124_v14 = vld [vmem:[%s2455_s4 + $0x188] sm:$0xff] }
  0x3a   :  { %959 = vmatpush1.bf16.msra.mxu0 %v958_v34  ;;  %v268_v12 = vld [vmem:[%s2459_s8 + $0x170] sm:$0xff]  ;;  %v126_v15 = vld [vmem:[%s2455_s4 + $0x198] sm:$0xff]  ;;  %v70_v16 = vld [vmem:[%s2473_s19 + $0x8] sm:$0xff]  ;;  %v974_v20 = vpack.c.bf16 %v121_v10, %v119_v7 }
  0x3b   :  { %1023 = vmatpush1.bf16.msra.mxu1 %v1022_v35  ;;  %961 = vmatprep.subr.bf16.mxu0 %v960_v36  ;;  %v271_v17 = vld [vmem:[%s2459_s8 + $0x188] sm:$0xff]  ;;  %v273_v18 = vld [vmem:[%s2459_s8 + $0x198] sm:$0xff]  ;;  %v1038_v21 = vpack.c.bf16 %v268_v12, %v266_v11  ;;  %v976_v22 = vpack.c.bf16 %v126_v15, %v124_v14  ;;  %v123_v23 = vld [vmem:[%s2455_s4 + $0x180] sm:$0xff] }
  0x3c   :  { %1025 = vmatprep.subr.bf16.mxu1 %v1024_v40  ;;  %215 = vmatprep.mubr.f32.mxu0 %v70_v16  ;;  %v1761_v19 = vld [vmem:[%s2454_s3 + $0x8] sm:$0xff]  ;;  %v125_v24 = vld [vmem:[%s2455_s4 + $0x190] sm:$0xff]  ;;  %v270_v25 = vld [vmem:[%s2459_s8 + $0x180] sm:$0xff]  ;;  %v1040_v26 = vpack.c.bf16 %v273_v18, %v271_v17 }
  0x3d   :  { %362 = vmatprep.mubr.f32.mxu1 %v1761_v19  ;;  %v272_v27 = vld [vmem:[%s2459_s8 + $0x190] sm:$0xff]  ;;  %v128_v28 = vld [vmem:[%s2455_s4 + $0x1a8] sm:$0xff]  ;;  %v130_v29 = vld [vmem:[%s2455_s4 + $0x1b8] sm:$0xff]  ;;  %v978_v32 = vpack.c.bf16 %v125_v24, %v123_v23 }
  0x3e   :  { %963 = vmatpush1.bf16.msra.mxu0 %v962_v46  ;;  %v275_v30 = vld [vmem:[%s2459_s8 + $0x1a8] sm:$0xff]  ;;  %v277_v31 = vld [vmem:[%s2459_s8 + $0x1b8] sm:$0xff]  ;;  %v1042_v33 = vpack.c.bf16 %v272_v27, %v270_v25  ;;  %v980_v34 = vpack.c.bf16 %v130_v29, %v128_v28  ;;  %v127_v35 = vld [vmem:[%s2455_s4 + $0x1a0] sm:$0xff] }
  0x3f   :  { %1027 = vmatpush1.bf16.msra.mxu1 %v1026_v47  ;;  %965 = vmatprep.subr.bf16.mxu0 %v964_v48  ;;  %v129_v36 = vld [vmem:[%s2455_s4 + $0x1b0] sm:$0xff]  ;;  %v274_v37 = vld [vmem:[%s2459_s8 + $0x1a0] sm:$0xff]  ;;  %v1044_v38 = vpack.c.bf16 %v277_v31, %v275_v30  ;;  %v132_v40 = vld [vmem:[%s2455_s4 + $0x1c8] sm:$0xff] }
  0x40   :  { %1029 = vmatprep.subr.bf16.mxu1 %v1028_v52  ;;  %v276_v39 = vld [vmem:[%s2459_s8 + $0x1b0] sm:$0xff]  ;;  %v134_v41 = vld [vmem:[%s2455_s4 + $0x1d8] sm:$0xff]  ;;  %v279_v42 = vld [vmem:[%s2459_s8 + $0x1c8] sm:$0xff]  ;;  %v982_v44 = vpack.c.bf16 %v129_v36, %v127_v35 }
  0x41   :  { %v281_v43 = vld [vmem:[%s2459_s8 + $0x1d8] sm:$0xff]  ;;  %v1046_v45 = vpack.c.bf16 %v276_v39, %v274_v37  ;;  %v984_v46 = vpack.c.bf16 %v134_v41, %v132_v40  ;;  %v131_v47 = vld [vmem:[%s2455_s4 + $0x1c0] sm:$0xff]  ;;  %v133_v48 = vld [vmem:[%s2455_s4 + $0x1d0] sm:$0xff] }
  0x42   :  { %967 = vmatpush1.bf16.msra.mxu0 %v966_v58  ;;  %v278_v49 = vld [vmem:[%s2459_s8 + $0x1c0] sm:$0xff]  ;;  %v1048_v50 = vpack.c.bf16 %v281_v43, %v279_v42  ;;  %v280_v51 = vld [vmem:[%s2459_s8 + $0x1d0] sm:$0xff]  ;;  %v136_v52 = vld [vmem:[%s2455_s4 + $0x1e8] sm:$0xff]  ;;  %v986_v56 = vpack.c.bf16 %v133_v48, %v131_v47 }
  0x43   :  { %1031 = vmatpush1.bf16.msra.mxu1 %v1030_v59  ;;  %969 = vmatprep.subr.bf16.mxu0 %v968_v60  ;;  %v138_v53 = vld [vmem:[%s2455_s4 + $0x1f8] sm:$0xff]  ;;  %v283_v54 = vld [vmem:[%s2459_s8 + $0x1e8] sm:$0xff]  ;;  %v1050_v57 = vpack.c.bf16 %v280_v51, %v278_v49  ;;  %v135_v59 = vld [vmem:[%s2455_s4 + $0x1e0] sm:$0xff] }
  0x44   :  { %1033 = vmatprep.subr.bf16.mxu1 %v1032_v0  ;;  %v285_v55 = vld [vmem:[%s2459_s8 + $0x1f8] sm:$0xff]  ;;  %v988_v58 = vpack.c.bf16 %v138_v53, %v136_v52  ;;  %v137_v60 = vld [vmem:[%s2455_s4 + $0x1f0] sm:$0xff]  ;;  %v282_v61 = vld [vmem:[%s2459_s8 + $0x1e0] sm:$0xff]  ;;  %s856_s4 = sshll.u32 %s1358_s29, 4  ;;  %s857_s4 = int_to_ptr.vmem [resolvable:$true] %s856_s4 }
  0x45   :  { %v1052_v62 = vpack.c.bf16 %v285_v55, %v283_v54  ;;  %v284_v63 = vld [vmem:[%s2459_s8 + $0x1f0] sm:$0xff]  ;;  %v372_v0 = vld [vmem:[%s2461_s10 + $0x8] sm:$0xff]  ;;  %v374_v1 = vld [vmem:[%s2461_s10 + $0x18] sm:$0xff]  ;;  %v990_v4 = vpack.c.bf16 %v137_v60, %v135_v59 }
  0x46   :  { %971 = vmatpush1.bf16.msra.mxu0 %v970_v6  ;;  %v533_v2 = vld [vmem:[%s2457_s6 + $0x8] sm:$0xff]  ;;  %v535_v3 = vld [vmem:[%s2457_s6 + $0x18] sm:$0xff]  ;;  %v1054_v5 = vpack.c.bf16 %v284_v63, %v282_v61  ;;  %v1056_v6 = vpack.c.bf16 %v374_v1, %v372_v0  ;;  %v371_v7 = vld [vmem:[%s2461_s10] sm:$0xff] }
  0x47   :  { %1035 = vmatpush1.bf16.msra.mxu1 %v1034_v8  ;;  %973 = vmatprep.subr.bf16.mxu0 %v972_v9  ;;  %v373_v8 = vld [vmem:[%s2461_s10 + $0x10] sm:$0xff]  ;;  %v376_v9 = vld [vmem:[%s2461_s10 + $0x28] sm:$0xff]  ;;  %v378_v10 = vld [vmem:[%s2461_s10 + $0x38] sm:$0xff]  ;;  %v1120_v11 = vpack.c.bf16 %v535_v3, %v533_v2 }
  0x48   :  { %1037 = vmatprep.subr.bf16.mxu1 %v1036_v13  ;;  %v532_v12 = vld [vmem:[%s2457_s6] sm:$0xff]  ;;  %v534_v13 = vld [vmem:[%s2457_s6 + $0x10] sm:$0xff]  ;;  %v537_v14 = vld [vmem:[%s2457_s6 + $0x28] sm:$0xff]  ;;  %v1058_v18 = vpack.c.bf16 %v373_v8, %v371_v7 }
  0x49   :  { %v539_v15 = vld [vmem:[%s2457_s6 + $0x38] sm:$0xff]  ;;  %v69_v16 = vld [vmem:[%s2473_s19] sm:$0xff]  ;;  %v1122_v23 = vpack.c.bf16 %v534_v13, %v532_v12  ;;  %v380_v24 = vld [vmem:[%s2461_s10 + $0x48] sm:$0xff] }
  0x4a   :  { %975 = vmatpush1.bf16.msra.mxu0 %v974_v20  ;;  %v1890_v17 = vld [vmem:[%s2454_s3] sm:$0xff]  ;;  %v1060_v20 = vpack.c.bf16 %v378_v10, %v376_v9  ;;  %v382_v25 = vld [vmem:[%s2461_s10 + $0x58] sm:$0xff]  ;;  %v538_v28 = vld [vmem:[%s2457_s6 + $0x30] sm:$0xff] }
  0x4b   :  { %1039 = vmatpush1.bf16.msra.mxu1 %v1038_v21  ;;  %977 = vmatprep.subr.bf16.mxu0 %v976_v22  ;;  %v375_v21 = vld [vmem:[%s2461_s10 + $0x20] sm:$0xff]  ;;  %v377_v22 = vld [vmem:[%s2461_s10 + $0x30] sm:$0xff]  ;;  %v541_v29 = vld [vmem:[%s2457_s6 + $0x48] sm:$0xff] }
  0x4c   :  { %1041 = vmatprep.subr.bf16.mxu1 %v1040_v26  ;;  %v1124_v26 = vpack.c.bf16 %v539_v15, %v537_v14  ;;  %v536_v27 = vld [vmem:[%s2457_s6 + $0x20] sm:$0xff]  ;;  %v543_v30 = vld [vmem:[%s2457_s6 + $0x58] sm:$0xff]  ;;  %v1062_v31 = vpack.c.bf16 %v377_v22, %v375_v21  ;;  %v384_v36 = vld [vmem:[%s2461_s10 + $0x68] sm:$0xff] }
  0x4d   :  { %v1126_v35 = vpack.c.bf16 %v538_v28, %v536_v27  ;;  %v386_v37 = vld [vmem:[%s2461_s10 + $0x78] sm:$0xff]  ;;  %v540_v39 = vld [vmem:[%s2457_s6 + $0x40] sm:$0xff]  ;;  %v542_v40 = vld [vmem:[%s2457_s6 + $0x50] sm:$0xff] }
  0x4e   :  { %979 = vmatpush1.bf16.msra.mxu0 %v978_v32  ;;  %v1064_v32 = vpack.c.bf16 %v382_v25, %v380_v24  ;;  %v545_v41 = vld [vmem:[%s2457_s6 + $0x68] sm:$0xff]  ;;  %v547_v42 = vld [vmem:[%s2457_s6 + $0x78] sm:$0xff]  ;;  %v1130_v47 = vpack.c.bf16 %v542_v40, %v540_v39  ;;  %v544_v51 = vld [vmem:[%s2457_s6 + $0x60] sm:$0xff] }
  0x4f   :  { %1043 = vmatpush1.bf16.msra.mxu1 %v1042_v33  ;;  %981 = vmatprep.subr.bf16.mxu0 %v980_v34  ;;  %v379_v33 = vld [vmem:[%s2461_s10 + $0x40] sm:$0xff]  ;;  %v381_v34 = vld [vmem:[%s2461_s10 + $0x50] sm:$0xff]  ;;  %v388_v48 = vld [vmem:[%s2461_s10 + $0x88] sm:$0xff] }
  0x50   :  { %1045 = vmatprep.subr.bf16.mxu1 %v1044_v38  ;;  %v1128_v38 = vpack.c.bf16 %v543_v30, %v541_v29  ;;  %v1066_v43 = vpack.c.bf16 %v381_v34, %v379_v33  ;;  %v390_v49 = vld [vmem:[%s2461_s10 + $0x98] sm:$0xff]  ;;  %v546_v52 = vld [vmem:[%s2457_s6 + $0x70] sm:$0xff]  ;;  %v549_v53 = vld [vmem:[%s2457_s6 + $0x88] sm:$0xff] }
  0x51   :  { %v551_v54 = vld [vmem:[%s2457_s6 + $0x98] sm:$0xff]  ;;  %v1134_v59 = vpack.c.bf16 %v546_v52, %v544_v51  ;;  %v392_v60 = vld [vmem:[%s2461_s10 + $0xa8] sm:$0xff]  ;;  %v548_v63 = vld [vmem:[%s2457_s6 + $0x80] sm:$0xff] }
  0x52   :  { %983 = vmatpush1.bf16.msra.mxu0 %v982_v44  ;;  %v1068_v44 = vpack.c.bf16 %v386_v37, %v384_v36  ;;  %v394_v61 = vld [vmem:[%s2461_s10 + $0xb8] sm:$0xff]  ;;  %v550_v0 = vld [vmem:[%s2457_s6 + $0x90] sm:$0xff]  ;;  %v553_v1 = vld [vmem:[%s2457_s6 + $0xa8] sm:$0xff] }
  0x53   :  { %1047 = vmatpush1.bf16.msra.mxu1 %v1046_v45  ;;  %985 = vmatprep.subr.bf16.mxu0 %v984_v46  ;;  %v383_v45 = vld [vmem:[%s2461_s10 + $0x60] sm:$0xff]  ;;  %v385_v46 = vld [vmem:[%s2461_s10 + $0x70] sm:$0xff]  ;;  %v555_v2 = vld [vmem:[%s2457_s6 + $0xb8] sm:$0xff]  ;;  %v1138_v7 = vpack.c.bf16 %v550_v0, %v548_v63 }
  0x54   :  { %1049 = vmatprep.subr.bf16.mxu1 %v1048_v50  ;;  %v1132_v50 = vpack.c.bf16 %v547_v42, %v545_v41  ;;  %v1070_v55 = vpack.c.bf16 %v385_v46, %v383_v45  ;;  %v396_v8 = vld [vmem:[%s2461_s10 + $0xc8] sm:$0xff]  ;;  %v398_v9 = vld [vmem:[%s2461_s10 + $0xd8] sm:$0xff]  ;;  %v1140_v10 = vpack.c.bf16 %v555_v2, %v553_v1  ;;  %v554_v12 = vld [vmem:[%s2457_s6 + $0xb0] sm:$0xff] }
  0x55   :  { %v557_v13 = vld [vmem:[%s2457_s6 + $0xc8] sm:$0xff]  ;;  %v559_v14 = vld [vmem:[%s2457_s6 + $0xd8] sm:$0xff]  ;;  %v556_v25 = vld [vmem:[%s2457_s6 + $0xc0] sm:$0xff] }
  0x56   :  { %987 = vmatpush1.bf16.msra.mxu0 %v986_v56  ;;  %v1072_v56 = vpack.c.bf16 %v390_v49, %v388_v48  ;;  %v400_v22 = vld [vmem:[%s2461_s10 + $0xe8] sm:$0xff]  ;;  %v1144_v24 = vpack.c.bf16 %v559_v14, %v557_v13  ;;  %v563_v28 = vld [vmem:[%s2457_s6 + $0xf8] sm:$0xff]  ;;  %v560_v37 = vld [vmem:[%s2457_s6 + $0xe0] sm:$0xff] }
  0x57   :  { %1051 = vmatpush1.bf16.msra.mxu1 %v1050_v57  ;;  %989 = vmatprep.subr.bf16.mxu0 %v988_v58  ;;  %v387_v57 = vld [vmem:[%s2461_s10 + $0x80] sm:$0xff]  ;;  %v389_v58 = vld [vmem:[%s2461_s10 + $0x90] sm:$0xff]  ;;  %v561_v27 = vld [vmem:[%s2457_s6 + $0xe8] sm:$0xff] }
  0x58   :  { %1053 = vmatprep.subr.bf16.mxu1 %v1052_v62  ;;  %v1136_v62 = vpack.c.bf16 %v551_v54, %v549_v53  ;;  %v1074_v3 = vpack.c.bf16 %v389_v58, %v387_v57  ;;  %v404_v34 = vld [vmem:[%s2461_s10 + $0x108] sm:$0xff]  ;;  %v1148_v36 = vpack.c.bf16 %v563_v28, %v561_v27  ;;  %v567_v40 = vld [vmem:[%s2457_s6 + $0x118] sm:$0xff]  ;;  %v564_v49 = vld [vmem:[%s2457_s6 + $0x100] sm:$0xff] }
  0x59   :  { %v565_v39 = vld [vmem:[%s2457_s6 + $0x108] sm:$0xff]  ;;  %v571_v52 = vld [vmem:[%s2457_s6 + $0x138] sm:$0xff] }
  0x5a   :  { %991 = vmatpush1.bf16.msra.mxu0 %v990_v4  ;;  %v1076_v4 = vpack.c.bf16 %v394_v61, %v392_v60  ;;  %v408_v46 = vld [vmem:[%s2461_s10 + $0x128] sm:$0xff]  ;;  %v1152_v48 = vpack.c.bf16 %v567_v40, %v565_v39  ;;  %v568_v61 = vld [vmem:[%s2457_s6 + $0x120] sm:$0xff]  ;;  %v575_v0 = vld [vmem:[%s2457_s6 + $0x158] sm:$0xff] }
  0x5b   :  { %1055 = vmatpush1.bf16.msra.mxu1 %v1054_v5  ;;  %1057 = vmatprep.subr.bf16.mxu0 %v1056_v6  ;;  %v391_v5 = vld [vmem:[%s2461_s10 + $0xa0] sm:$0xff]  ;;  %v393_v6 = vld [vmem:[%s2461_s10 + $0xb0] sm:$0xff]  ;;  %v569_v51 = vld [vmem:[%s2457_s6 + $0x128] sm:$0xff] }
  0x5c   :  { %1121 = vmatprep.subr.bf16.mxu1 %v1120_v11  ;;  %v552_v11 = vld [vmem:[%s2457_s6 + $0xa0] sm:$0xff]  ;;  %v1078_v15 = vpack.c.bf16 %v393_v6, %v391_v5  ;;  %v412_v58 = vld [vmem:[%s2461_s10 + $0x148] sm:$0xff]  ;;  %v1156_v60 = vpack.c.bf16 %v571_v52, %v569_v51  ;;  %v425_v40 = vld [vmem:[%s2461_s10 + $0x1b0] sm:$0xff] }
  0x5d   :  { %216 = vmatmul.mubr.f32.vlgmr.msra.gmra.mrb[0].mxu0 %v69_v16  ;;  %v1080_v16 = vpack.c.bf16 %v398_v9, %v396_v8  ;;  %v1142_v21 = vpack.c.bf16 %v554_v12, %v552_v11  ;;  %v573_v63 = vld [vmem:[%s2457_s6 + $0x148] sm:$0xff]  ;;  %v572_v9 = vld [vmem:[%s2457_s6 + $0x140] sm:$0xff]  ;;  %v579_v12 = vld [vmem:[%s2457_s6 + $0x178] sm:$0xff] }
  0x5e   :  { %363 = vmatmul.mubr.f32.vlgmr.msra.gmra.mrb[0].mxu1 %v1890_v17  ;;  %1059 = vmatpush1.bf16.msra.mxu0 %v1058_v18  ;;  %v395_v18 = vld [vmem:[%s2461_s10 + $0xc0] sm:$0xff]  ;;  %v416_v6 = vld [vmem:[%s2461_s10 + $0x168] sm:$0xff]  ;;  %v1160_v8 = vpack.c.bf16 %v575_v0, %v573_v63 }
  0x5f   :  { %1061 = vmatprep.subr.bf16.mxu0 %v1060_v20  ;;  %1123 = vmatpush1.bf16.msra.mxu1 %v1122_v23  ;;  %v397_v20 = vld [vmem:[%s2461_s10 + $0xd0] sm:$0xff]  ;;  %v402_v23 = vld [vmem:[%s2461_s10 + $0xf8] sm:$0xff]  ;;  %v577_v11 = vld [vmem:[%s2457_s6 + $0x168] sm:$0xff] }
  0x60   :  { %1125 = vmatprep.subr.bf16.mxu1 %v1124_v26  ;;  %v558_v26 = vld [vmem:[%s2457_s6 + $0xd0] sm:$0xff]  ;;  %v1082_v29 = vpack.c.bf16 %v397_v20, %v395_v18  ;;  %v1084_v30 = vpack.c.bf16 %v402_v23, %v400_v22  ;;  %v420_v20 = vld [vmem:[%s2461_s10 + $0x188] sm:$0xff]  ;;  %v1164_v22 = vpack.c.bf16 %v579_v12, %v577_v11  ;;  %v576_v23 = vld [vmem:[%s2457_s6 + $0x160] sm:$0xff]  ;;  %v141_v12 = vlaneseq }
  0x61   :  { %v1146_v33 = vpack.c.bf16 %v558_v26, %v556_v25  ;;  %v581_v25 = vld [vmem:[%s2457_s6 + $0x188] sm:$0xff]  ;;  %v583_v26 = vld [vmem:[%s2457_s6 + $0x198] sm:$0xff]  ;;  %v423_v39 = vld [vmem:[%s2461_s10 + $0x1a0] sm:$0xff] }
  0x62   :  { %1063 = vmatpush1.bf16.msra.mxu0 %v1062_v31  ;;  %v399_v31 = vld [vmem:[%s2461_s10 + $0xe0] sm:$0xff] }
  0x63   :  { %1065 = vmatprep.subr.bf16.mxu0 %v1064_v32  ;;  %1127 = vmatpush1.bf16.msra.mxu1 %v1126_v35  ;;  %v401_v32 = vld [vmem:[%s2461_s10 + $0xf0] sm:$0xff]  ;;  %v406_v35 = vld [vmem:[%s2461_s10 + $0x118] sm:$0xff]  ;;  %v584_v52 = vld [vmem:[%s2457_s6 + $0x1a0] sm:$0xff] }
  0x64   :  { %1129 = vmatprep.subr.bf16.mxu1 %v1128_v38  ;;  %v562_v38 = vld [vmem:[%s2457_s6 + $0xf0] sm:$0xff]  ;;  %v1086_v41 = vpack.c.bf16 %v401_v32, %v399_v31  ;;  %v1088_v42 = vpack.c.bf16 %v406_v35, %v404_v34  ;;  %v424_v32 = vld [vmem:[%s2461_s10 + $0x1a8] sm:$0xff]  ;;  %v1168_v34 = vpack.c.bf16 %v583_v26, %v581_v25  ;;  %v580_v35 = vld [vmem:[%s2457_s6 + $0x180] sm:$0xff] }
  0x65   :  { %v1150_v45 = vpack.c.bf16 %v562_v38, %v560_v37  ;;  %v588_v0 = vld [vmem:[%s2457_s6 + $0x1c0] sm:$0xff] }
  0x66   :  { %1067 = vmatpush1.bf16.msra.mxu0 %v1066_v43  ;;  %v403_v43 = vld [vmem:[%s2461_s10 + $0x100] sm:$0xff] }
  0x67   :  { %1069 = vmatprep.subr.bf16.mxu0 %v1068_v44  ;;  %1131 = vmatpush1.bf16.msra.mxu1 %v1130_v47  ;;  %v405_v44 = vld [vmem:[%s2461_s10 + $0x110] sm:$0xff]  ;;  %v410_v47 = vld [vmem:[%s2461_s10 + $0x138] sm:$0xff]  ;;  %v71_v25 = vld [vmem:[%s2453_s2] sm:$0xff] }
  0x68   :  { %1133 = vmatprep.subr.bf16.mxu1 %v1132_v50  ;;  %v566_v50 = vld [vmem:[%s2457_s6 + $0x110] sm:$0xff]  ;;  %v1090_v53 = vpack.c.bf16 %v405_v44, %v403_v43  ;;  %v1092_v54 = vpack.c.bf16 %v410_v47, %v408_v46  ;;  %v430_v43 = vld [vmem:[%s2461_s10 + $0x1d8] sm:$0xff]  ;;  %v1110_v44 = vpack.c.bf16 %v425_v40, %v423_v39  ;;  %v427_v46 = vld [vmem:[%s2461_s10 + $0x1c0] sm:$0xff]  ;;  %v525_v39 = vstv %s2249_s23 }
  0x69   :  { %v1154_v57 = vpack.c.bf16 %v566_v50, %v564_v49  ;;  %v429_v47 = vld [vmem:[%s2461_s10 + $0x1d0] sm:$0xff]  ;;  %v585_v49 = vld [vmem:[%s2457_s6 + $0x1a8] sm:$0xff]  ;;  %v587_v50 = vld [vmem:[%s2457_s6 + $0x1b8] sm:$0xff] }
  0x6a   :  { %1071 = vmatpush1.bf16.msra.mxu0 %v1070_v55  ;;  %v407_v55 = vld [vmem:[%s2461_s10 + $0x120] sm:$0xff]  ;;  %v1172_v51 = vpack.c.bf16 %v587_v50, %v585_v49 }
  0x6b   :  { %1073 = vmatprep.subr.bf16.mxu0 %v1072_v56  ;;  %1135 = vmatpush1.bf16.msra.mxu1 %v1134_v59  ;;  %v409_v56 = vld [vmem:[%s2461_s10 + $0x130] sm:$0xff]  ;;  %v414_v59 = vld [vmem:[%s2461_s10 + $0x158] sm:$0xff] }
  0x6c   :  { %1137 = vmatprep.subr.bf16.mxu1 %v1136_v62  ;;  %v570_v62 = vld [vmem:[%s2457_s6 + $0x130] sm:$0xff]  ;;  %v1094_v1 = vpack.c.bf16 %v409_v56, %v407_v55  ;;  %v1096_v2 = vpack.c.bf16 %v414_v59, %v412_v58  ;;  %v432_v55 = vld [vmem:[%s2461_s10 + $0x1e8] sm:$0xff]  ;;  %v434_v56 = vld [vmem:[%s2461_s10 + $0x1f8] sm:$0xff] }
  0x6d   :  { %v1158_v5 = vpack.c.bf16 %v570_v62, %v568_v61  ;;  %v431_v58 = vld [vmem:[%s2461_s10 + $0x1e0] sm:$0xff]  ;;  %v433_v59 = vld [vmem:[%s2461_s10 + $0x1f0] sm:$0xff]  ;;  %v589_v61 = vld [vmem:[%s2457_s6 + $0x1c8] sm:$0xff] }
  0x6e   :  { %1075 = vmatpush1.bf16.msra.mxu0 %v1074_v3  ;;  %v411_v3 = vld [vmem:[%s2461_s10 + $0x140] sm:$0xff]  ;;  %v591_v62 = vld [vmem:[%s2457_s6 + $0x1d8] sm:$0xff] }
  0x6f   :  { %1077 = vmatprep.subr.bf16.mxu0 %v1076_v4  ;;  %1139 = vmatpush1.bf16.msra.mxu1 %v1138_v7  ;;  %v413_v4 = vld [vmem:[%s2461_s10 + $0x150] sm:$0xff]  ;;  %v418_v7 = vld [vmem:[%s2461_s10 + $0x178] sm:$0xff]  ;;  %v1176_v63 = vpack.c.bf16 %v591_v62, %v589_v61 }
  0x70   :  { %1141 = vmatprep.subr.bf16.mxu1 %v1140_v10  ;;  %v574_v10 = vld [vmem:[%s2457_s6 + $0x150] sm:$0xff]  ;;  %v1098_v13 = vpack.c.bf16 %v413_v4, %v411_v3  ;;  %v1100_v14 = vpack.c.bf16 %v418_v7, %v416_v6  ;;  %v593_v3 = vld [vmem:[%s2457_s6 + $0x1e8] sm:$0xff]  ;;  %v595_v4 = vld [vmem:[%s2457_s6 + $0x1f8] sm:$0xff] }
  0x71   :  { %v1162_v18 = vpack.c.bf16 %v574_v10, %v572_v9  ;;  %v592_v6 = vld [vmem:[%s2457_s6 + $0x1e0] sm:$0xff]  ;;  %v594_v7 = vld [vmem:[%s2457_s6 + $0x1f0] sm:$0xff]  ;;  %v712_v10 = vld [vmem:[%s2462_s11 + $0x88] sm:$0xff] }
  0x72   :  { %1079 = vmatpush1.bf16.msra.mxu0 %v1078_v15  ;;  %v415_v15 = vld [vmem:[%s2461_s10 + $0x160] sm:$0xff] }
  0x73   :  { %1081 = vmatprep.subr.bf16.mxu0 %v1080_v16  ;;  %1143 = vmatpush1.bf16.msra.mxu1 %v1142_v21  ;;  %v417_v16 = vld [vmem:[%s2461_s10 + $0x170] sm:$0xff]  ;;  %v422_v21 = vld [vmem:[%s2461_s10 + $0x198] sm:$0xff]  ;;  %v711_v9 = vld [vmem:[%s2462_s11 + $0x80] sm:$0xff] }
  0x74   :  { %1145 = vmatprep.subr.bf16.mxu1 %v1144_v24  ;;  %v578_v24 = vld [vmem:[%s2457_s6 + $0x170] sm:$0xff]  ;;  %v1102_v27 = vpack.c.bf16 %v417_v16, %v415_v15  ;;  %v1104_v28 = vpack.c.bf16 %v422_v21, %v420_v20  ;;  %v1184_v11 = vpack.c.bf16 %v712_v10, %v711_v9  ;;  %v139_v15 = vld [vmem:[%s2456_s5] sm:$0x3]  ;;  %s890_s5 = sld [smem:[#allocation2 + $0x2]] }
  0x75   :  { %v1166_v31 = vpack.c.bf16 %v578_v24, %v576_v23  ;;  %v719_v10 = vld [vmem:[%s2462_s11 + $0xc0] sm:$0xff] }
  0x76   :  { %1083 = vmatpush1.bf16.msra.mxu0 %v1082_v29  ;;  %v419_v29 = vld [vmem:[%s2461_s10 + $0x180] sm:$0xff] }
  0x77   :  { %1085 = vmatprep.subr.bf16.mxu0 %v1084_v30  ;;  %1147 = vmatpush1.bf16.msra.mxu1 %v1146_v33  ;;  %v421_v30 = vld [vmem:[%s2461_s10 + $0x190] sm:$0xff]  ;;  %v426_v33 = vld [vmem:[%s2461_s10 + $0x1b8] sm:$0xff] }
  0x78   :  { %1149 = vmatprep.subr.bf16.mxu1 %v1148_v36  ;;  %v582_v36 = vld [vmem:[%s2457_s6 + $0x190] sm:$0xff]  ;;  %v1106_v37 = vpack.c.bf16 %v421_v30, %v419_v29  ;;  %v1108_v38 = vpack.c.bf16 %v426_v33, %v424_v32  ;;  %v2274_v30 = vstv %s2247_s22  ;;  %v72_v33 = vld [vmem:[%s2453_s2 + $0x8] sm:$0xff] }
  0x7a   :  { %1087 = vmatpush1.bf16.msra.mxu0 %v1086_v41  ;;  %v1170_v41 = vpack.c.bf16 %v582_v36, %v580_v35  ;;  %v695_v35 = vld [vmem:[%s2462_s11] sm:$0xff]  ;;  %v696_v36 = vld [vmem:[%s2462_s11 + $0x8] sm:$0xff] }
  0x7b   :  { %1089 = vmatprep.subr.bf16.mxu0 %v1088_v42  ;;  %1151 = vmatpush1.bf16.msra.mxu1 %v1150_v45  ;;  %v428_v42 = vld [vmem:[%s2461_s10 + $0x1c8] sm:$0xff]  ;;  %v1186_v50 = vpack.c.bf16 %v696_v36, %v695_v35  ;;  %v726_v35 = vld [vmem:[%s2462_s11 + $0xf8] sm:$0xff] }
  0x7c   :  { %1153 = vmatprep.subr.bf16.mxu1 %v1152_v48  ;;  %v1112_v45 = vpack.c.bf16 %v430_v43, %v428_v42  ;;  %v1114_v48 = vpack.c.bf16 %v429_v47, %v427_v46  ;;  %v714_v42 = vld [vmem:[%s2462_s11 + $0x98] sm:$0xff] }
  0x7e   :  { %1091 = vmatpush1.bf16.msra.mxu0 %v1090_v53  ;;  %v586_v53 = vld [vmem:[%s2457_s6 + $0x1b0] sm:$0xff] }
  0x7f   :  { %1093 = vmatprep.subr.bf16.mxu0 %v1092_v54  ;;  %1155 = vmatpush1.bf16.msra.mxu1 %v1154_v57  ;;  %v1174_v54 = vpack.c.bf16 %v586_v53, %v584_v52  ;;  %v1116_v57 = vpack.c.bf16 %v434_v56, %v432_v55  ;;  %v698_v55 = vld [vmem:[%s2462_s11 + $0x18] sm:$0xff] }
  0x80   :  { %1157 = vmatprep.subr.bf16.mxu1 %v1156_v60  ;;  %v1118_v60 = vpack.c.bf16 %v433_v59, %v431_v58  ;;  %v715_v58 = vld [vmem:[%s2462_s11 + $0xa0] sm:$0xff]  ;;  %v716_v59 = vld [vmem:[%s2462_s11 + $0xa8] sm:$0xff] }
  0x82   :  { %1095 = vmatpush1.bf16.msra.mxu0 %v1094_v1  ;;  %v590_v1 = vld [vmem:[%s2457_s6 + $0x1d0] sm:$0xff]  ;;  %s516_s6 = ssub.f32 1.0, %s2247_s22  ;;  %s1357_s22 = smov [#allocation6]  }
  0x83   :  { %1097 = vmatprep.subr.bf16.mxu0 %v1096_v2  ;;  %1159 = vmatpush1.bf16.msra.mxu1 %v1158_v5  ;;  %v1178_v2 = vpack.c.bf16 %v590_v1, %v588_v0  ;;  %v1180_v5 = vpack.c.bf16 %v595_v4, %v593_v3  ;;  %v1192_v0 = vpack.c.bf16 %v716_v59, %v715_v58  ;;  %v699_v1 = vld [vmem:[%s2462_s11 + $0x20] sm:$0xff]  ;;  %v717_v3 = vld [vmem:[%s2462_s11 + $0xb0] sm:$0xff]  ;;  %v718_v4 = vld [vmem:[%s2462_s11 + $0xb8] sm:$0xff] }
  0x84   :  { %1161 = vmatprep.subr.bf16.mxu1 %v1160_v8  ;;  %v1182_v8 = vpack.c.bf16 %v594_v7, %v592_v6  ;;  %s517_s26 = ssub.f32 %s516_s6, %s2249_s23  ;;  %v1196_v6 = vpack.c.bf16 %v718_v4, %v717_v3  ;;  %v701_v7 = vld [vmem:[%s2462_s11 + $0x30] sm:$0xff] }
  0x86   :  { %1099 = vmatpush1.bf16.msra.mxu0 %v1098_v13  ;;  %v142_v13 = vshrl.u32 %v141_v12, 7  ;;  %v518_v26 = vstv %s517_s26 }
  0x87   :  { %1101 = vmatprep.subr.bf16.mxu0 %v1100_v14  ;;  %1163 = vmatpush1.bf16.msra.mxu1 %v1162_v18  ;;  %v286_v18 = vld [vmem:[%s2460_s9] sm:$0x3]  ;;  %v520_v46 = vmul.f32 %v518_v26, %v72_v33 }
  0x88   :  { %1165 = vmatprep.subr.bf16.mxu1 %v1164_v22  ;;  %v2253_v14 = vsub.s32 0, %v142_v13  ;;  %v2258_v16 = vsub.s32 1, %v142_v13 }
  0x8a   :  { %1103 = vmatpush1.bf16.msra.mxu0 %v1102_v27  ;;  %v144_v20 = vrot.slane %v139_v15, %v2253_v14  ;;  %v291_v21 = vrot.slane %v286_v18, %v2253_v14  ;;  %v148_v22 = vrot.slane %v139_v15, %v2258_v16  ;;  %v295_v23 = vrot.slane %v286_v18, %v2258_v16  ;;  %v703_v15 = vld [vmem:[%s2462_s11 + $0x40] sm:$0xff]  ;;  %v704_v18 = vld [vmem:[%s2462_s11 + $0x48] sm:$0xff] }
  0x8b   :  { %1105 = vmatprep.subr.bf16.mxu0 %v1104_v28  ;;  %1167 = vmatpush1.bf16.msra.mxu1 %v1166_v31 }
  0x8c   :  { %1169 = vmatprep.subr.bf16.mxu1 %v1168_v34 }
  0x8e   :  { %1107 = vmatpush1.bf16.msra.mxu0 %v1106_v37 }
  0x8f   :  { %1109 = vmatprep.subr.bf16.mxu0 %v1108_v38  ;;  %1171 = vmatpush1.bf16.msra.mxu1 %v1170_v41  ;;  %v519_v38 = vmul.f32 %v518_v26, %v71_v25  ;;  %v713_v41 = vld [vmem:[%s2462_s11 + $0x90] sm:$0xff] }
  0x90   :  { %1173 = vmatprep.subr.bf16.mxu1 %v1172_v51  ;;  %v1188_v53 = vpack.c.bf16 %v714_v42, %v713_v41  ;;  %v596_v41 = vld [vmem:[%s2458_s7] sm:$0x3] }
  0x92   :  { %1111 = vmatpush1.bf16.msra.mxu0 %v1110_v44 }
  0x93   :  { %1113 = vmatprep.subr.bf16.mxu0 %v1112_v45  ;;  %1175 = vmatpush1.bf16.msra.mxu1 %v1174_v54  ;;  %v697_v54 = vld [vmem:[%s2462_s11 + $0x10] sm:$0xff] }
  0x94   :  { %1177 = vmatprep.subr.bf16.mxu1 %v1176_v63  ;;  %v1190_v62 = vpack.c.bf16 %v698_v55, %v697_v54 }
  0x96   :  { %1115 = vmatpush1.bf16.msra.mxu0 %v1114_v48 }
  0x97   :  { %1117 = vmatprep.subr.bf16.mxu0 %v1116_v57  ;;  %1179 = vmatpush1.bf16.msra.mxu1 %v1178_v2  ;;  %v700_v2 = vld [vmem:[%s2462_s11 + $0x28] sm:$0xff] }
  0x98   :  { %1181 = vmatprep.subr.bf16.mxu1 %v1180_v5  ;;  %v1194_v5 = vpack.c.bf16 %v700_v2, %v699_v1  ;;  %v892_v1 = vld [vmem:[%s2463_s12] ss:$0 sm:$0xff] }
  0x9a   :  { %1119 = vmatpush1.bf16.msra.mxu0 %v1118_v60 }
  0x9b   :  { %1183 = vmatpush1.bf16.msra.mxu1 %v1182_v8  ;;  %1185 = vmatprep.subr.bf16.mxu0 %v1184_v11  ;;  %v702_v8 = vld [vmem:[%s2462_s11 + $0x38] sm:$0xff]  ;;  %v720_v11 = vld [vmem:[%s2462_s11 + $0xc8] sm:$0xff] }
  0x9c   :  { %v1198_v9 = vpack.c.bf16 %v702_v8, %v701_v7  ;;  %v1200_v13 = vpack.c.bf16 %v720_v11, %v719_v10 }
 0x130   :  { %v217_v24 = vpop.f32.mrb[0].mxu0 }
 0x131   :  { %v218_v27 = vadd.f32 %v217_v24, %v144_v20  ;;  %v364_v28 = vpop.f32.mrb[0].mxu1  ;;  %v219_v29 = vpop.f32.mrb[1].mxu0  ;;  %v1202_v20 = vpack.c.bf16 %v704_v18, %v703_v15  ;;  %v705_v24 = vld [vmem:[%s2462_s11 + $0x50] sm:$0xff] }
 0x132   :  { %v365_v31 = vadd.f32 %v364_v28, %v291_v21  ;;  %v220_v32 = vadd.f32 %v219_v29, %v148_v22  ;;  %v366_v34 = vpop.f32.mrb[1].mxu1  ;;  %v721_v21 = vld [vmem:[%s2462_s11 + $0xd0] sm:$0xff]  ;;  %v722_v22 = vld [vmem:[%s2462_s11 + $0xd8] sm:$0xff]  ;;  %v724_v28 = vld [vmem:[%s2462_s11 + $0xe8] sm:$0xff] }
 0x133   :  { %v511_v37 = vmax.f32 %v218_v27, 0.0  ;;  %v367_v40 = vadd.f32 %v366_v34, %v295_v23  ;;  %v1204_v23 = vpack.c.bf16 %v722_v22, %v721_v21  ;;  %v723_v27 = vld [vmem:[%s2462_s11 + $0xe0] sm:$0xff]  ;;  %v725_v34 = vld [vmem:[%s2462_s11 + $0xf0] sm:$0xff] }
 0x134   :  { %v369_v43 = vsub.f32 %v365_v31, %v71_v25  ;;  %v523_v44 = vmax.f32 %v365_v31, 0.0  ;;  %v512_v45 = vmax.f32 %v220_v32, 0.0  ;;  %v706_v25 = vld [vmem:[%s2462_s11 + $0x58] sm:$0xff]  ;;  %v1208_v29 = vpack.c.bf16 %v724_v28, %v723_v27  ;;  %v707_v31 = vld [vmem:[%s2462_s11 + $0x60] sm:$0xff]  ;;  %v708_v32 = vld [vmem:[%s2462_s11 + $0x68] sm:$0xff] }
 0x135   :  { %v514_v47 = vmul.f32 %v2274_v30, %v511_v37  ;;  %v370_v48 = vsub.f32 %v367_v40, %v72_v33  ;;  %v524_v49 = vmax.f32 %v367_v40, 0.0  ;;  %v1206_v26 = vpack.c.bf16 %v706_v25, %v705_v24  ;;  %v709_v37 = vld [vmem:[%s2462_s11 + $0x70] sm:$0xff] }
 0x136   :  { %v526_v51 = vmul.f32 %v525_v39, %v523_v44  ;;  %v515_v52 = vmul.f32 %v2274_v30, %v512_v45  ;;  %v1210_v33 = vpack.c.bf16 %v708_v32, %v707_v31  ;;  %v1212_v36 = vpack.c.bf16 %v726_v35, %v725_v34 }
 0x137   :  { %v521_v56 = vadd.f32 %v519_v38, %v514_v47  ;;  %v527_v57 = vmul.f32 %v525_v39, %v524_v49  ;;  %499 = vmatprep.mubr.f32.mxu0 %v370_v48  ;;  %v710_v38 = vld [vmem:[%s2462_s11 + $0x78] sm:$0xff]  ;;  %v506_v40 = vstv %s890_s5  ;;  %v605_v47 = vrot.slane %v596_v41, %v2258_v16 }
 0x138   :  { %500 = vmatmul.mubr.f32.vlgmr.msra.gmra.mrb[2].mxu0 %v369_v43  ;;  %v522_v60 = vadd.f32 %v520_v46, %v515_v52  ;;  %v1214_v39 = vpack.c.bf16 %v710_v38, %v709_v37  ;;  %v601_v46 = vrot.slane %v596_v41, %v2253_v14  ;;  %v683_v48 = vstv %s516_s6  ;;  %s836_s6 = sshll.u32 %s1357_s22, 4  ;;  %s837_s6 = int_to_ptr.vmem [resolvable:$true] %s836_s6 }
 0x139   :  { %v528_v61 = vadd.f32 %v526_v51, %v521_v56  ;;  %1187 = vmatpush3.bf16.msra.mxu0 %v1186_v50  ;;  %v685_v55 = vmul.f32 %v683_v48, %v1761_v19  ;;  %v688_v56 = vstv %s891_s28  ;;  %s1238_s12 = scalar_lea.vmem %s837_s6, 256  ;;  %p1243_p6 = scmp.lt.s32.totalorder %s837_s6, %s837_s6 }
 0x13a   :  { %v529_v63 = vadd.f32 %v527_v57, %v522_v60  ;;  %1189 = vmatprep.subr.bf16.mxu0 %v1188_v53  ;;  %v684_v53 = vmul.f32 %v683_v48, %v1890_v17  ;;  %v806_v17 = vand.u32 127, %v141_v12  ;;  %p1239_p5 = scmp.ne.s32.totalorder %s837_s6, %s1238_s12  ;;  %p1244_p7 = scmp.lt.s32.totalorder %s1238_s12, %s1238_s12 }
 0x13b   :  { %530 = vst [vmem:[#allocation6] sm:$0xff] %v528_v61 }
 0x13c   :  { %672 = vmatprep.mubr.f32.mxu1 %v529_v63  ;;  %531 = vst [vmem:[#allocation6 + $0x8] sm:$0xff] %v529_v63  ;;  %vm807_vm0 = vcmp.lt.s32.totalorder %v806_v17, 10  ;;  %p1245_p8 = por %p1244_p7, %p1243_p6 }
 0x13d   :  { %673 = vmatmul.mubr.f32.vlgmr.msra.gmra.mrb[2].mxu1 %v528_v61  ;;  %1191 = vmatpush3.bf16.msra.mxu0 %v1190_v62 }
 0x13e   :  { %1193 = vmatprep.subr.bf16.mxu0 %v1192_v0  ;;  %p1246_p9 = pnand %p1245_p8, %p1239_p5 }
 0x141   :  { %1195 = vmatpush3.bf16.msra.mxu0 %v1194_v5 }
 0x142   :  { %1197 = vmatprep.subr.bf16.mxu0 %v1196_v6 }
 0x145   :  { %1199 = vmatpush3.bf16.msra.mxu0 %v1198_v9 }
 0x146   :  { %1201 = vmatprep.subr.bf16.mxu0 %v1200_v13 }
 0x149   :  { %1203 = vmatpush3.bf16.msra.mxu0 %v1202_v20 }
 0x14a   :  { %1205 = vmatprep.subr.bf16.mxu0 %v1204_v23 }
 0x14d   :  { %1207 = vmatpush3.bf16.msra.mxu0 %v1206_v26 }
 0x14e   :  { %1209 = vmatprep.subr.bf16.mxu0 %v1208_v29 }
 0x151   :  { %1211 = vmatpush3.bf16.msra.mxu0 %v1210_v33 }
 0x152   :  { %1213 = vmatprep.subr.bf16.mxu0 %v1212_v36 }
 0x155   :  { %1215 = vmatpush3.bf16.msra.mxu0 %v1214_v39 }
 0x20b   :  { %v501_v42 = vpop.f32.mrb[2].mxu0 }
 0x20c   :  { %v507_v43 = vmul.f32 %v506_v40, %v501_v42  ;;  %v503_v44 = vpop.f32.mrb[3].mxu0 }
 0x20d   :  { %v508_v45 = vmul.f32 %v506_v40, %v503_v44 }
 0x20e   :  { %509 = vst [vmem:[#allocation11] sm:$0xff] %v507_v43  ;;  %v689_v59 = vmul.f32 %v688_v56, %v507_v43 }
 0x20f   :  { %510 = vst [vmem:[#allocation11 + $0x8] sm:$0xff] %v508_v45  ;;  %v690_v60 = vmul.f32 %v688_v56, %v508_v45 }
 0x210   :  { %v674_v49 = vpop.f32.mrb[2].mxu1 }
 0x211   :  { %v675_v50 = vadd.f32 %v674_v49, %v601_v46  ;;  %v676_v51 = vpop.f32.mrb[3].mxu1 }
 0x212   :  { %v677_v52 = vadd.f32 %v676_v51, %v605_v47 }
 0x213   :  { %v679_v54 = vmax.f32 %v675_v50, 0.0 }
 0x214   :  { %v680_v57 = vmax.f32 %v677_v52, 0.0 }
 0x215   :  { %v681_v58 = vmul.f32 %v679_v54, %v2274_v30 }
 0x216   :  { %v682_v14 = vmul.f32 %v680_v57, %v2274_v30 }
 0x217   :  { %v686_v16 = vadd.f32 %v684_v53, %v681_v58 }
 0x218   :  { %v687_v61 = vadd.f32 %v685_v55, %v682_v14 }
 0x219   :  { %v691_v62 = vsub.f32 %v686_v16, %v689_v59 }
 0x21a   :  { %v692_v63 = vsub.f32 %v687_v61, %v690_v60 }
 0x21b   :  { %693 = vst [vmem:[#allocation8] sm:$0xff] %v691_v62 }
 0x21c   :  { %798 = vmatprep.mubr.f32.mxu0 %v692_v63  ;;  %694 = vst [vmem:[#allocation8 + $0x8] sm:$0xff] %v692_v63 }
 0x21d   :  { %799 = vmatmul.mubr.f32.vlgmr.msra.gmra.mrb[4].mxu0 %v691_v62 }
 0x2f0   :  { %v925_v0 = vpop.f32.mrb[4].mxu0 }
 0x2f1   :  { %v926_v19 = vpop.f32.mrb[5].mxu0 }
 0x2f2   :  { %v927_v2 = vadd.f32 %v926_v19, %v925_v0 }
 0x2f4   :  { %v801_v30 = vadd.f32 %v927_v2, %v892_v1 }
 0x2f6   :  { %v808_v3 = vsel %vm807_vm0, %v801_v30, -1e+30  ;;  %804 = vst [vmem:[#allocation9] sm:$0xff] %v801_v30 }
 0x2f7   :  { %809 = vmax.xlane.f32.xlu0 %v808_v3 }
 0x384   :  { %v810_v4 = vpop.xlane.xlu0 %809 }
 0x385   :  { %v2387_v5 = vsub.f32 %v808_v3, %v810_v4 }
 0x387   :  { %v812_v6 = vmul.f32 1.442695, %v2387_v5 }
 0x389   :  { %1222 = vpow2.f32 %v812_v6 }
 0x393   :  { %v1223_v7 = vpop.eup %1222 }
 0x394   :  { %814 = vadd.xlane.f32.xlu0 %v1223_v7 }
 0x395   :  { %1249 = shalt.err (!%p1246_p9)
}
 0x396   :  { %s1250_s8 = scalar_lea.hbm %s2465_s14, 256 }
 0x397   :  { %p1251_p10 = scmp.ne.s32.totalorder %s2465_s14, %s1250_s8  ;;  %p1254_p11 = scmp.lt.u32.totalorder %s1250_s8, %s2465_s14 }
 0x399   :  { %p1256_p12 = pnand %p1254_p11, %p1251_p10 }
 0x39b   :  { %1259 = shalt.err (!%p1256_p12)
}
 0x39c   :  { %839 = dma.vmem_to_hbm [thread:$0]  %s837_s6, 256, %s2465_s14, [#allocation7]  }
 0x39d   :  { %s1260_s24 = scalar_lea.vmem %s857_s4, 128  ;;  %p1265_p0 = scmp.lt.s32.totalorder %s857_s4, %s857_s4 }
 0x39e   :  { %p1261_p13 = scmp.ne.s32.totalorder %s857_s4, %s1260_s24  ;;  %p1266_p1 = scmp.lt.s32.totalorder %s1260_s24, %s1260_s24 }
 0x3a0   :  { %p1267_p2 = por %p1266_p1, %p1265_p0 }
 0x3a2   :  { %p1268_p3 = pnand %p1267_p2, %p1261_p13 }
 0x3a4   :  { %1271 = shalt.err (!%p1268_p3)
}
 0x3a5   :  { %s1272_s3 = scalar_lea.hbm %s2467_s16, 128 }
 0x3a6   :  { %p1273_p4 = scmp.ne.s32.totalorder %s2467_s16, %s1272_s3  ;;  %p1276_p5 = scmp.lt.u32.totalorder %s1272_s3, %s2467_s16 }
 0x3a8   :  { %p1278_p6 = pnand %p1276_p5, %p1273_p4 }
 0x3aa   :  { %1281 = shalt.err (!%p1278_p6)
}
 0x3ab   :  { %859 = dma.vmem_to_hbm [thread:$0]  %s857_s4, 128, %s2467_s16, [#allocation10]  }
 0x3ac   :  { %s1359_s28 = smov [#allocation8]  }
 0x3ad   :  { %s846_s7 = sshll.u32 %s1359_s28, 4  ;;  %s847_s7 = int_to_ptr.vmem [resolvable:$true] %s846_s7 }
 0x3ae   :  { %s1282_s11 = scalar_lea.vmem %s847_s7, 256  ;;  %p1287_p8 = scmp.lt.s32.totalorder %s847_s7, %s847_s7 }
 0x3af   :  { %p1283_p7 = scmp.ne.s32.totalorder %s847_s7, %s1282_s11  ;;  %p1288_p9 = scmp.lt.s32.totalorder %s1282_s11, %s1282_s11 }
 0x3b1   :  { %p1289_p10 = por %p1288_p9, %p1287_p8 }
 0x3b3   :  { %p1290_p11 = pnand %p1289_p10, %p1283_p7 }
 0x3b5   :  { %1293 = shalt.err (!%p1290_p11)
}
 0x3b6   :  { %s1294_s29 = scalar_lea.hbm %s2466_s15, 256 }
 0x3b7   :  { %p1295_p12 = scmp.ne.s32.totalorder %s2466_s15, %s1294_s29  ;;  %p1298_p13 = scmp.lt.u32.totalorder %s1294_s29, %s2466_s15 }
 0x3b9   :  { %p1300_p0 = pnand %p1298_p13, %p1295_p12 }
 0x3bb   :  { %1303 = shalt.err (!%p1300_p0)
}
 0x3bc   :  { %849 = dma.vmem_to_hbm [thread:$0]  %s847_s7, 256, %s2466_s15, [#allocation7]  }
 0x3bd   :  { %s1360_s18 = smov [#allocation11]  }
 0x3be   :  { %s866_s1 = sshll.u32 %s1360_s18, 4  ;;  %s867_s1 = int_to_ptr.vmem [resolvable:$true] %s866_s1 }
 0x3bf   :  { %s1304_s2 = scalar_lea.vmem %s867_s1, 256  ;;  %p1309_p2 = scmp.lt.s32.totalorder %s867_s1, %s867_s1 }
 0x3c0   :  { %p1305_p1 = scmp.ne.s32.totalorder %s867_s1, %s1304_s2  ;;  %p1310_p3 = scmp.lt.s32.totalorder %s1304_s2, %s1304_s2 }
 0x3c2   :  { %p1311_p4 = por %p1310_p3, %p1309_p2 }
 0x3c4   :  { %p1312_p5 = pnand %p1311_p4, %p1305_p1 }
 0x3c6   :  { %1315 = shalt.err (!%p1312_p5)
}
 0x3c7   :  { %s1316_s23 = scalar_lea.hbm %s2468_s17, 256 }
 0x3c8   :  { %p1317_p6 = scmp.ne.s32.totalorder %s2468_s17, %s1316_s23  ;;  %p1320_p7 = scmp.lt.u32.totalorder %s1316_s23, %s2468_s17 }
 0x3ca   :  { %p1322_p8 = pnand %p1320_p7, %p1317_p6 }
 0x3cc   :  { %1325 = shalt.err (!%p1322_p8)
}
 0x3cd   :  { %869 = dma.vmem_to_hbm [thread:$0]  %s867_s1, 256, %s2468_s17, [#allocation10]  }
 0x3ce   :  { %s1361_s10 = smov [#allocation5]  }
 0x3cf   :  { %s826_s5 = sshll.u32 %s1361_s10, 4  ;;  %s827_s5 = int_to_ptr.vmem [resolvable:$true] %s826_s5 }
 0x3d0   :  { %s1326_s9 = scalar_lea.vmem %s827_s5, 128  ;;  %p1331_p10 = scmp.lt.s32.totalorder %s827_s5, %s827_s5 }
 0x3d1   :  { %p1327_p9 = scmp.ne.s32.totalorder %s827_s5, %s1326_s9  ;;  %p1332_p11 = scmp.lt.s32.totalorder %s1326_s9, %s1326_s9 }
 0x3d3   :  { %p1333_p12 = por %p1332_p11, %p1331_p10 }
 0x3d5   :  { %p1334_p13 = pnand %p1333_p12, %p1327_p9 }
 0x421   :  { %v815_v12 = vpop.xlane.xlu0 %814 }
 0x422   :  { %1224 = vlog2.f32 %v815_v12 }
 0x42c   :  { %v1225_v8 = vpop.eup %1224 }
 0x42d   :  { %v817_v9 = vmul.f32 0.6931472, %v1225_v8 }
 0x42f   :  { %v818_v10 = vsub.f32 %v2387_v5, %v817_v9 }
 0x431   :  { %819 = vst [vmem:[#allocation5] sm:$0xff] %v818_v10 }
 0x432   :  { %1337 = shalt.err (!%p1334_p13)
}
 0x433   :  { %s1338_s17 = scalar_lea.hbm %s2464_s13, 128 }
 0x434   :  { %p1339_p0 = scmp.ne.s32.totalorder %s2464_s13, %s1338_s17  ;;  %p1342_p1 = scmp.lt.u32.totalorder %s1338_s17, %s2464_s13 }
 0x436   :  { %p1344_p2 = pnand %p1342_p1, %p1339_p0 }
 0x438   :  { %1347 = shalt.err (!%p1344_p2)
}
 0x439   :  { %829 = dma.vmem_to_hbm [thread:$0]  %s827_s5, 128, %s2464_s13, [#allocation3]  }
 0x43a   :  { %1350 = dma.done.wait [#allocation3], 128  }
 0x43b   :  { %1351 = vsyncadd [#allocation3], 4294967168 }
 0x43c   :  { %1352 = dma.done.wait [#allocation7], 512  }
 0x43d   :  { %1353 = vsyncadd [#allocation7], 4294966784 }
 0x43e   :  { %1354 = dma.done.wait [#allocation10], 384  }
 0x43f   :  { %1355 = vsyncadd [#allocation10], 4294966912 }
 0x440   :  { %885 = vsyncpa [#allocation3], 1 }
 0x441   :  { %886 = vsyncpa [#allocation7], 1 }
 0x442   :  { %887 = vsyncpa [#allocation10], 1 }
 0x443   :  { %888 = vsyncpa [#allocation4], 1 }

</bundles_post_ra>
